<compile_context>
chip_gen: v7x
topology: tpu7x:2x2x1
jax: 0.10.0
libtpu: 0.0.40
codegen_flags: <defaults>
</compile_context>

<pallas_src>
import functools

import jax
import jax.numpy as jnp
from jax.experimental import pallas as pl
from jax.experimental.pallas import tpu as pltpu


def _attend_head(qh2, kh2, vh2, wfc_slice, bb, t, k, rows):
    """One head: scores, softmax over the *query* axis, value mix, and its
    contribution to the output projection (accumulated, no head concat)."""
    qh = qh2.reshape(bb, t, k)
    kh = kh2.reshape(bb, t, k)
    vh = vh2.reshape(bb, t, k)
    # s[b, i, j] = key_i . query_j  (softmax over j == query axis, matching
    # torch.softmax(dot, dim=2) in the reference).
    s = jax.lax.dot_general(kh, qh, (((2,), (2,)), ((0,), (0,))),
                            preferred_element_type=jnp.float32)
    s = s - jnp.max(s, axis=-1, keepdims=True)
    e = jnp.exp(s)
    attn = (e * pl.reciprocal(jnp.sum(e, axis=-1, keepdims=True),
                              approx=True)).astype(jnp.bfloat16)
    ho = jax.lax.dot_general(attn, vh, (((2,), (1,)), ((0,), (0,))),
                             preferred_element_type=jnp.float32)
    return jax.lax.dot_general(ho.reshape(rows, k).astype(jnp.bfloat16),
                               wfc_slice, (((1,), (0,)), ((), ())),
                               preferred_element_type=jnp.float32)


def _tblock_kernel(x_ref,
                   wqkv_ref, bqkv_ref, wfc_ref, w1_ref, b1_ref, w2_ref,
                   small_ref,            # rows: bfc, g1, be1, b2, g2, be2
                   o_ref, *, heads, seq_len):
    """One grid step == bb batch elements, presented as a lane-dense
    (rows=bb*t, k) slab.  Fused QKV projection, per-head attention with
    accumulated output projection, 2x LayerNorm, FFN."""
    rows, k = x_ref.shape
    t = seq_len
    bb = rows // t
    h = heads
    hk = h * k

    x2d = x_ref[...].astype(jnp.float32)          # f32 residual copy
    xb = x2d.astype(jnp.bfloat16)

    def mm(a_bf16, w_bf16):
        return jax.lax.dot_general(a_bf16, w_bf16,
                                   (((1,), (0,)), ((), ())),
                                   preferred_element_type=jnp.float32)

    # Fused Q/K/V projection.  The combined 1/sqrt(k) attention scale is
    # already folded into the q columns of wqkv / bqkv by the wrapper.
    # Single bf16 copy of the (rows, 3hk) result (no f32 copy kept live).
    qkv = (mm(xb, wqkv_ref[...]) + bqkv_ref[...]).astype(jnp.bfloat16)
    q = qkv[:, 0:hk]
    key = qkv[:, hk:2 * hk]
    v = qkv[:, 2 * hk:3 * hk]

    if h <= 4:
        # Small head counts: static unroll, static lane slices.
        acc = jnp.zeros((rows, k), jnp.float32)
        for hi in range(h):
            sl = slice(hi * k, (hi + 1) * k)
            acc = acc + _attend_head(q[:, sl], key[:, sl], v[:, sl],
                                     wfc_ref[sl, :], bb, t, k, rows)
    else:
        # Larger head counts: fori_loop bounds the per-head live ranges
        # (a static Python `for` would keep all heads' s/e/attn live).
        def body(hi, acc):
            off = hi * k
            qh = jax.lax.dynamic_slice_in_dim(q, off, k, axis=1)
            kh = jax.lax.dynamic_slice_in_dim(key, off, k, axis=1)
            vh = jax.lax.dynamic_slice_in_dim(v, off, k, axis=1)
            return acc + _attend_head(qh, kh, vh, wfc_ref[pl.ds(off, k), :],
                                      bb, t, k, rows)
        acc = jax.lax.fori_loop(0, h, body,
                                jnp.zeros((rows, k), jnp.float32),
                                unroll=True)

    bfc = small_ref[0:1, :]
    g1 = small_ref[1:2, :]
    be1 = small_ref[2:3, :]
    b2 = small_ref[3:4, :]
    g2 = small_ref[4:5, :]
    be2 = small_ref[5:6, :]

    attended = acc + bfc                                        # (rows, k) f32

    def layernorm(z, g, beta):
        mu = jnp.mean(z, axis=-1, keepdims=True)
        var = jnp.mean(jnp.square(z - mu), axis=-1, keepdims=True)
        return (z - mu) * jax.lax.rsqrt(var + 1e-5) * g + beta

    y = layernorm(attended + x2d, g1, be1)                      # (rows, k) f32

    hidden = jnp.maximum(mm(y.astype(jnp.bfloat16), w1_ref[...]) + b1_ref[...],
                         0.0).astype(jnp.bfloat16)              # (rows, 4k) bf16
    ff = mm(hidden, w2_ref[...]) + b2                           # (rows, k) f32

    o_ref[...] = layernorm(ff + y, g2, be2).astype(o_ref.dtype)


def _device_kind():
    try:
        return jax.devices()[0].device_kind.lower()
    except Exception:
        return ""


def _vmem_limit_bytes():
    kind = _device_kind()
    if "v7" in kind or "7x" in kind:
        return 56 * 1024 * 1024     # 64 MiB physical per TensorCore on v7x
    return 100 * 1024 * 1024        # 128 MiB physical on v5e / v6e


def _pick_batch_block(b, t):
    """Rows per step: target MXU row fill (256 on v6e/v7x, 128 on v5e) while
    keeping >= 2 grid steps so the parallel axis can use both v7x cores."""
    kind = _device_kind()
    target_rows = 128 if "v5" in kind else 256
    divisors = [d for d in range(1, b + 1) if b % d == 0]
    aligned = [d for d in divisors if (d * t) % 8 == 0 or d == b]
    if aligned:
        divisors = aligned
    multi = [d for d in divisors if b // d >= 2]
    pool = multi if multi else divisors
    for d in pool:
        if d * t >= target_rows:
            return d
    return pool[-1]


def tblock_forward(x, params, heads, *, batch_block=None):
    b, t, k = x.shape
    bb = batch_block if batch_block is not None else _pick_batch_block(b, t)
    assert b % bb == 0
    rows = bb * t

    bf16 = jnp.bfloat16
    scale = 1.0 / (k ** 0.5)    # combined q/k scaling, folded into wq / bq once
    wqkv = jnp.concatenate([params["wq"] * scale, params["wk"], params["wv"]],
                           axis=1).astype(bf16)                 # (k, 3hk)
    bqkv = jnp.concatenate([params["bq"] * scale, params["bk"], params["bv"]],
                           axis=1).astype(jnp.float32)          # (1, 3hk)
    wfc = params["wfc"].astype(bf16)                            # (hk, k)
    w1 = params["w1"].astype(bf16)                              # (k, 4k)
    b1 = params["b1"].astype(jnp.float32)                       # (1, 4k)
    w2 = params["w2"].astype(bf16)                              # (4k, k)
    small = jnp.concatenate([params["bfc"], params["g1"], params["be1"],
                             params["b2"], params["g2"], params["be2"]],
                            axis=0).astype(jnp.float32)         # (6, k)
    weights = [wqkv, bqkv, wfc, w1, b1, w2, small]

    # Block-invariant weights: whole-array VMEM residency, NOT pipelined
    # (no double buffering, no per-step DMA descriptors).
    vmem_spec = pl.BlockSpec(memory_space=pltpu.MemorySpace.VMEM)

    # Lane-dense 2-D layout for x / out: unmasked full-lane vst stores, and no
    # in-kernel (bb,t,k)<->(rows,k) relayout of the activations block.
    x2d = x.reshape(b * t, k)

    kernel = functools.partial(_tblock_kernel, heads=heads, seq_len=t)
    out2d = pl.pallas_call(
        kernel,
        out_shape=jax.ShapeDtypeStruct((b * t, k), x.dtype),
        grid=(b // bb,),
        in_specs=[pl.BlockSpec((rows, k), lambda i: (i, 0))]
                 + [vmem_spec] * len(weights),
        out_specs=pl.BlockSpec((rows, k), lambda i: (i, 0)),
        compiler_params=pltpu.CompilerParams(
            dimension_semantics=("parallel",),
            vmem_limit_bytes=_vmem_limit_bytes()),
    )(x2d, *weights)
    return out2d.reshape(b, t, k)


def init_params(key, k, heads):
    """Deterministic synthetic parameters mirroring the module's shapes.
    Weights are stored as (in_features, out_features)."""
    hk = heads * k
    keys = jax.random.split(key, 12)

    def lin(kw, kb, fan_in, fan_out):
        bound = 1.0 / (fan_in ** 0.5)
        w = jax.random.uniform(kw, (fan_in, fan_out), jnp.float32, -bound, bound)
        bias = jax.random.uniform(kb, (1, fan_out), jnp.float32, -bound, bound)
        return w, bias

    wq, bq = lin(keys[0], keys[1], k, hk)
    wk, bk = lin(keys[2], keys[3], k, hk)
    wv, bv = lin(keys[4], keys[5], k, hk)
    wfc, bfc = lin(keys[6], keys[7], hk, k)
    w1, b1 = lin(keys[8], keys[9], k, 4 * k)
    w2, b2 = lin(keys[10], keys[11], 4 * k, k)
    g1 = jnp.ones((1, k), jnp.float32)
    be1 = jnp.zeros((1, k), jnp.float32)
    g2 = jnp.ones((1, k), jnp.float32)
    be2 = jnp.zeros((1, k), jnp.float32)
    return dict(wq=wq, bq=bq, wk=wk, bk=bk, wv=wv, bv=bv, wfc=wfc, bfc=bfc,
                g1=g1, be1=be1, w1=w1, b1=b1, w2=w2, b2=b2, g2=g2, be2=be2)


def tblock_ref(x, p, heads, matmul_dtype=jnp.float32):
    """Pure-JAX reference mirroring the PyTorch forward.  With
    matmul_dtype=bf16 it mirrors the kernel's mixed-precision matmul inputs
    (f32 accumulation, f32 softmax / LayerNorm)."""
    b, t, k = x.shape
    md = matmul_dtype

    def mm(a, w):
        return jax.lax.dot_general(a.astype(md), w.astype(md),
                                   (((a.ndim - 1,), (0,)), ((), ())),
                                   preferred_element_type=jnp.float32)

    q = (mm(x, p["wq"]) + p["bq"]).reshape(b, t, heads, k)
    kk = (mm(x, p["wk"]) + p["bk"]).reshape(b, t, heads, k)
    v = (mm(x, p["wv"]) + p["bv"]).reshape(b, t, heads, k)
    # combined 1/sqrt(k) scaling folded into q (identical to k**-0.25 on both).
    qs = (jnp.transpose(q, (0, 2, 1, 3)).reshape(b * heads, t, k)
          * (1.0 / k ** 0.5))
    ks = jnp.transpose(kk, (0, 2, 1, 3)).reshape(b * heads, t, k)
    vs = jnp.transpose(v, (0, 2, 1, 3)).reshape(b * heads, t, k)
    dot = jnp.einsum("bik,bjk->bij", ks.astype(md), qs.astype(md),
                     preferred_element_type=jnp.float32)
    attn = jax.nn.softmax(dot, axis=2)          # softmax over the query axis
    out = jnp.einsum("bij,bjk->bik", attn.astype(md), vs.astype(md),
                     preferred_element_type=jnp.float32).reshape(b, heads, t, k)
    out = jnp.transpose(out, (0, 2, 1, 3)).reshape(b, t, heads * k)
    attended = mm(out, p["wfc"]) + p["bfc"]

    def ln(z, g, be):
        mu = z.mean(-1, keepdims=True)
        var = ((z - mu) ** 2).mean(-1, keepdims=True)
        return (z - mu) / jnp.sqrt(var + 1e-5) * g + be

    y = ln(attended + x, p["g1"], p["be1"])
    hdn = jax.nn.relu(mm(y, p["w1"]) + p["b1"])
    ff = mm(hdn, p["w2"]) + p["b2"]
    return ln(ff + y, p["g2"], p["be2"])


if __name__ == "__main__":
    k, heads, b, t = 32, 4, 2, 8
    root = jax.random.PRNGKey(0)
    kx, kp = jax.random.split(root)
    x = jax.random.normal(kx, (b, t, k), jnp.float32)
    params = init_params(kp, k, heads)

    out = jax.block_until_ready(tblock_forward(x, params, heads))
    assert out.shape == (b, t, k)

    # Tight check against a reference mirroring the kernel's bf16-matmul /
    # f32-accumulation numerics, plus a looser sanity check against full f32.
    ref_mixed = tblock_ref(x, params, heads, matmul_dtype=jnp.bfloat16)
    ref_f32 = tblock_ref(x, params, heads, matmul_dtype=jnp.float32)
    err_mixed = jnp.max(jnp.abs(out - ref_mixed))
    err_f32 = jnp.max(jnp.abs(out - ref_f32))
    assert jnp.allclose(out, ref_mixed, atol=2e-2, rtol=2e-2), (
        f"max abs err vs mixed-precision reference: {err_mixed}")
    assert jnp.allclose(out, ref_f32, atol=1e-1, rtol=1e-1), (
        f"max abs err vs f32 reference: {err_f32}")
    print("KERNEL_OK")
</pallas_src>

<mosaic_0001>
module attributes {stable_mosaic.version = 11 : i64} {
  func.func @_tblock_kernel(%arg0: i32, %arg1: memref<8x32xf32, #tpu.memory_space<vmem>>, %arg2: memref<32x384xbf16, #tpu.memory_space<vmem>>, %arg3: memref<1x384xf32, #tpu.memory_space<vmem>>, %arg4: memref<128x32xbf16, #tpu.memory_space<vmem>>, %arg5: memref<32x128xbf16, #tpu.memory_space<vmem>>, %arg6: memref<1x128xf32, #tpu.memory_space<vmem>>, %arg7: memref<128x32xbf16, #tpu.memory_space<vmem>>, %arg8: memref<6x32xf32, #tpu.memory_space<vmem>>, %arg9: memref<8x32xf32, #tpu.memory_space<vmem>>) attributes {dimension_semantics = [#tpu.dimension_semantics<parallel>], iteration_bounds = array<i64: 2>, scalar_prefetch = 0 : i64, scratch_operands = 0 : i64, tpu.core_type = #tpu.core_type<tc>, window_params = [{transform_indices = @transform_0, window_bounds = array<i64: 8, 32>}, {pipeline_mode = #tpu.pipeline_mode<synchronous>, transform_indices = @transform_1, window_bounds = array<i64: 32, 384>}, {pipeline_mode = #tpu.pipeline_mode<synchronous>, transform_indices = @transform_2, window_bounds = array<i64: 1, 384>}, {pipeline_mode = #tpu.pipeline_mode<synchronous>, transform_indices = @transform_3, window_bounds = array<i64: 128, 32>}, {pipeline_mode = #tpu.pipeline_mode<synchronous>, transform_indices = @transform_4, window_bounds = array<i64: 32, 128>}, {pipeline_mode = #tpu.pipeline_mode<synchronous>, transform_indices = @transform_5, window_bounds = array<i64: 1, 128>}, {pipeline_mode = #tpu.pipeline_mode<synchronous>, transform_indices = @transform_6, window_bounds = array<i64: 128, 32>}, {pipeline_mode = #tpu.pipeline_mode<synchronous>, transform_indices = @transform_7, window_bounds = array<i64: 6, 32>}, {transform_indices = @transform_8, window_bounds = array<i64: 8, 32>}]} {
    %c0 = arith.constant 0 : index
    %c0_0 = arith.constant 0 : index
    %0 = vector.load %arg1[%c0, %c0_0] : memref<8x32xf32, #tpu.memory_space<vmem>>, vector<8x32xf32>
    %1 = arith.truncf %0 : vector<8x32xf32> to vector<8x32xbf16>
    %c0_1 = arith.constant 0 : index
    %c0_2 = arith.constant 0 : index
    %2 = vector.load %arg2[%c0_1, %c0_2] : memref<32x384xbf16, #tpu.memory_space<vmem>>, vector<32x384xbf16>
    %cst = arith.constant dense<0.000000e+00> : vector<8x384xf32>
    %3 = tpu.matmul %1, %2, %cst {dimension_numbers = #tpu.dot_dimension_numbers<[1], [0], [0], [1], [0, 0, 1, 1], [], []>} : vector<8x32xbf16>, vector<32x384xbf16>, vector<8x384xf32> -> vector<8x384xf32>
    %c0_3 = arith.constant 0 : index
    %c0_4 = arith.constant 0 : index
    %4 = vector.load %arg3[%c0_3, %c0_4] : memref<1x384xf32, #tpu.memory_space<vmem>>, vector<1x384xf32>
    %5 = vector.broadcast %4 : vector<1x384xf32> to vector<8x384xf32>
    %6 = arith.addf %3, %5 : vector<8x384xf32>
    %7 = arith.truncf %6 : vector<8x384xf32> to vector<8x384xbf16>
    %8 = vector.extract_strided_slice %7 {offsets = [0, 0], sizes = [8, 128], strides = [1, 1]} : vector<8x384xbf16> to vector<8x128xbf16>
    %9 = vector.extract_strided_slice %7 {offsets = [0, 128], sizes = [8, 128], strides = [1, 1]} : vector<8x384xbf16> to vector<8x128xbf16>
    %10 = vector.extract_strided_slice %7 {offsets = [0, 256], sizes = [8, 128], strides = [1, 1]} : vector<8x384xbf16> to vector<8x128xbf16>
    %cst_5 = arith.constant 0.000000e+00 : f32
    %11 = vector.broadcast %cst_5 : f32 to vector<8x32xf32>
    %12 = vector.extract_strided_slice %8 {offsets = [0, 0], sizes = [8, 32], strides = [1, 1]} : vector<8x128xbf16> to vector<8x32xbf16>
    %13 = vector.extract_strided_slice %9 {offsets = [0, 0], sizes = [8, 32], strides = [1, 1]} : vector<8x128xbf16> to vector<8x32xbf16>
    %14 = vector.extract_strided_slice %10 {offsets = [0, 0], sizes = [8, 32], strides = [1, 1]} : vector<8x128xbf16> to vector<8x32xbf16>
    %c0_6 = arith.constant 0 : index
    %c0_7 = arith.constant 0 : index
    %15 = vector.load %arg4[%c0_6, %c0_7] : memref<128x32xbf16, #tpu.memory_space<vmem>>, vector<32x32xbf16>
    %16 = vector.shape_cast %12 : vector<8x32xbf16> to vector<1x8x32xbf16>
    %17 = vector.shape_cast %13 : vector<8x32xbf16> to vector<1x8x32xbf16>
    %18 = vector.shape_cast %14 : vector<8x32xbf16> to vector<1x8x32xbf16>
    %cst_8 = arith.constant dense<0.000000e+00> : vector<1x8x8xf32>
    %19 = tpu.matmul %17, %16, %cst_8 {dimension_numbers = #tpu.dot_dimension_numbers<[2], [2], [1], [1], [0, 0, 0, 1, 1, 1], [0], [0]>} : vector<1x8x32xbf16>, vector<1x8x32xbf16>, vector<1x8x8xf32> -> vector<1x8x8xf32>
    %cst_9 = arith.constant dense<0xFF800000> : vector<1x8xf32>
    %20 = vector.multi_reduction <maximumf>, %19, %cst_9 [2] : vector<1x8x8xf32> to vector<1x8xf32>
    %21 = vector.shape_cast %20 : vector<1x8xf32> to vector<1x8x1xf32>
    %22 = vector.broadcast %21 : vector<1x8x1xf32> to vector<1x8x8xf32>
    %23 = arith.subf %19, %22 : vector<1x8x8xf32>
    %24 = math.exp %23 : vector<1x8x8xf32>
    %cst_10 = arith.constant dense<0.000000e+00> : vector<1x8xf32>
    %25 = vector.multi_reduction <add>, %24, %cst_10 [2] : vector<1x8x8xf32> to vector<1x8xf32>
    %26 = vector.shape_cast %25 : vector<1x8xf32> to vector<1x8x1xf32>
    %27 = tpu.reciprocal %26 {approx = true} : vector<1x8x1xf32> -> vector<1x8x1xf32>
    %28 = vector.broadcast %27 : vector<1x8x1xf32> to vector<1x8x8xf32>
    %29 = arith.mulf %24, %28 : vector<1x8x8xf32>
    %30 = arith.truncf %29 : vector<1x8x8xf32> to vector<1x8x8xbf16>
    %cst_11 = arith.constant dense<0.000000e+00> : vector<1x8x32xf32>
    %31 = tpu.matmul %30, %18, %cst_11 {dimension_numbers = #tpu.dot_dimension_numbers<[2], [1], [1], [2], [0, 0, 0, 1, 1, 2], [0], [0]>} : vector<1x8x8xbf16>, vector<1x8x32xbf16>, vector<1x8x32xf32> -> vector<1x8x32xf32>
    %32 = vector.shape_cast %31 : vector<1x8x32xf32> to vector<8x32xf32>
    %33 = arith.truncf %32 : vector<8x32xf32> to vector<8x32xbf16>
    %cst_12 = arith.constant dense<0.000000e+00> : vector<8x32xf32>
    %34 = tpu.matmul %33, %15, %cst_12 {dimension_numbers = #tpu.dot_dimension_numbers<[1], [0], [0], [1], [0, 0, 1, 1], [], []>} : vector<8x32xbf16>, vector<32x32xbf16>, vector<8x32xf32> -> vector<8x32xf32>
    %35 = arith.addf %11, %34 : vector<8x32xf32>
    %36 = vector.extract_strided_slice %8 {offsets = [0, 32], sizes = [8, 32], strides = [1, 1]} : vector<8x128xbf16> to vector<8x32xbf16>
    %37 = vector.extract_strided_slice %9 {offsets = [0, 32], sizes = [8, 32], strides = [1, 1]} : vector<8x128xbf16> to vector<8x32xbf16>
    %38 = vector.extract_strided_slice %10 {offsets = [0, 32], sizes = [8, 32], strides = [1, 1]} : vector<8x128xbf16> to vector<8x32xbf16>
    %c32 = arith.constant 32 : index
    %c0_13 = arith.constant 0 : index
    %39 = vector.load %arg4[%c32, %c0_13] : memref<128x32xbf16, #tpu.memory_space<vmem>>, vector<32x32xbf16>
    %40 = vector.shape_cast %36 : vector<8x32xbf16> to vector<1x8x32xbf16>
    %41 = vector.shape_cast %37 : vector<8x32xbf16> to vector<1x8x32xbf16>
    %42 = vector.shape_cast %38 : vector<8x32xbf16> to vector<1x8x32xbf16>
    %cst_14 = arith.constant dense<0.000000e+00> : vector<1x8x8xf32>
    %43 = tpu.matmul %41, %40, %cst_14 {dimension_numbers = #tpu.dot_dimension_numbers<[2], [2], [1], [1], [0, 0, 0, 1, 1, 1], [0], [0]>} : vector<1x8x32xbf16>, vector<1x8x32xbf16>, vector<1x8x8xf32> -> vector<1x8x8xf32>
    %cst_15 = arith.constant dense<0xFF800000> : vector<1x8xf32>
    %44 = vector.multi_reduction <maximumf>, %43, %cst_15 [2] : vector<1x8x8xf32> to vector<1x8xf32>
    %45 = vector.shape_cast %44 : vector<1x8xf32> to vector<1x8x1xf32>
    %46 = vector.broadcast %45 : vector<1x8x1xf32> to vector<1x8x8xf32>
    %47 = arith.subf %43, %46 : vector<1x8x8xf32>
    %48 = math.exp %47 : vector<1x8x8xf32>
    %cst_16 = arith.constant dense<0.000000e+00> : vector<1x8xf32>
    %49 = vector.multi_reduction <add>, %48, %cst_16 [2] : vector<1x8x8xf32> to vector<1x8xf32>
    %50 = vector.shape_cast %49 : vector<1x8xf32> to vector<1x8x1xf32>
    %51 = tpu.reciprocal %50 {approx = true} : vector<1x8x1xf32> -> vector<1x8x1xf32>
    %52 = vector.broadcast %51 : vector<1x8x1xf32> to vector<1x8x8xf32>
    %53 = arith.mulf %48, %52 : vector<1x8x8xf32>
    %54 = arith.truncf %53 : vector<1x8x8xf32> to vector<1x8x8xbf16>
    %cst_17 = arith.constant dense<0.000000e+00> : vector<1x8x32xf32>
    %55 = tpu.matmul %54, %42, %cst_17 {dimension_numbers = #tpu.dot_dimension_numbers<[2], [1], [1], [2], [0, 0, 0, 1, 1, 2], [0], [0]>} : vector<1x8x8xbf16>, vector<1x8x32xbf16>, vector<1x8x32xf32> -> vector<1x8x32xf32>
    %56 = vector.shape_cast %55 : vector<1x8x32xf32> to vector<8x32xf32>
    %57 = arith.truncf %56 : vector<8x32xf32> to vector<8x32xbf16>
    %cst_18 = arith.constant dense<0.000000e+00> : vector<8x32xf32>
    %58 = tpu.matmul %57, %39, %cst_18 {dimension_numbers = #tpu.dot_dimension_numbers<[1], [0], [0], [1], [0, 0, 1, 1], [], []>} : vector<8x32xbf16>, vector<32x32xbf16>, vector<8x32xf32> -> vector<8x32xf32>
    %59 = arith.addf %35, %58 : vector<8x32xf32>
    %60 = vector.extract_strided_slice %8 {offsets = [0, 64], sizes = [8, 32], strides = [1, 1]} : vector<8x128xbf16> to vector<8x32xbf16>
    %61 = vector.extract_strided_slice %9 {offsets = [0, 64], sizes = [8, 32], strides = [1, 1]} : vector<8x128xbf16> to vector<8x32xbf16>
    %62 = vector.extract_strided_slice %10 {offsets = [0, 64], sizes = [8, 32], strides = [1, 1]} : vector<8x128xbf16> to vector<8x32xbf16>
    %c64 = arith.constant 64 : index
    %c0_19 = arith.constant 0 : index
    %63 = vector.load %arg4[%c64, %c0_19] : memref<128x32xbf16, #tpu.memory_space<vmem>>, vector<32x32xbf16>
    %64 = vector.shape_cast %60 : vector<8x32xbf16> to vector<1x8x32xbf16>
    %65 = vector.shape_cast %61 : vector<8x32xbf16> to vector<1x8x32xbf16>
    %66 = vector.shape_cast %62 : vector<8x32xbf16> to vector<1x8x32xbf16>
    %cst_20 = arith.constant dense<0.000000e+00> : vector<1x8x8xf32>
    %67 = tpu.matmul %65, %64, %cst_20 {dimension_numbers = #tpu.dot_dimension_numbers<[2], [2], [1], [1], [0, 0, 0, 1, 1, 1], [0], [0]>} : vector<1x8x32xbf16>, vector<1x8x32xbf16>, vector<1x8x8xf32> -> vector<1x8x8xf32>
    %cst_21 = arith.constant dense<0xFF800000> : vector<1x8xf32>
    %68 = vector.multi_reduction <maximumf>, %67, %cst_21 [2] : vector<1x8x8xf32> to vector<1x8xf32>
    %69 = vector.shape_cast %68 : vector<1x8xf32> to vector<1x8x1xf32>
    %70 = vector.broadcast %69 : vector<1x8x1xf32> to vector<1x8x8xf32>
    %71 = arith.subf %67, %70 : vector<1x8x8xf32>
    %72 = math.exp %71 : vector<1x8x8xf32>
    %cst_22 = arith.constant dense<0.000000e+00> : vector<1x8xf32>
    %73 = vector.multi_reduction <add>, %72, %cst_22 [2] : vector<1x8x8xf32> to vector<1x8xf32>
    %74 = vector.shape_cast %73 : vector<1x8xf32> to vector<1x8x1xf32>
    %75 = tpu.reciprocal %74 {approx = true} : vector<1x8x1xf32> -> vector<1x8x1xf32>
    %76 = vector.broadcast %75 : vector<1x8x1xf32> to vector<1x8x8xf32>
    %77 = arith.mulf %72, %76 : vector<1x8x8xf32>
    %78 = arith.truncf %77 : vector<1x8x8xf32> to vector<1x8x8xbf16>
    %cst_23 = arith.constant dense<0.000000e+00> : vector<1x8x32xf32>
    %79 = tpu.matmul %78, %66, %cst_23 {dimension_numbers = #tpu.dot_dimension_numbers<[2], [1], [1], [2], [0, 0, 0, 1, 1, 2], [0], [0]>} : vector<1x8x8xbf16>, vector<1x8x32xbf16>, vector<1x8x32xf32> -> vector<1x8x32xf32>
    %80 = vector.shape_cast %79 : vector<1x8x32xf32> to vector<8x32xf32>
    %81 = arith.truncf %80 : vector<8x32xf32> to vector<8x32xbf16>
    %cst_24 = arith.constant dense<0.000000e+00> : vector<8x32xf32>
    %82 = tpu.matmul %81, %63, %cst_24 {dimension_numbers = #tpu.dot_dimension_numbers<[1], [0], [0], [1], [0, 0, 1, 1], [], []>} : vector<8x32xbf16>, vector<32x32xbf16>, vector<8x32xf32> -> vector<8x32xf32>
    %83 = arith.addf %59, %82 : vector<8x32xf32>
    %84 = vector.extract_strided_slice %8 {offsets = [0, 96], sizes = [8, 32], strides = [1, 1]} : vector<8x128xbf16> to vector<8x32xbf16>
    %85 = vector.extract_strided_slice %9 {offsets = [0, 96], sizes = [8, 32], strides = [1, 1]} : vector<8x128xbf16> to vector<8x32xbf16>
    %86 = vector.extract_strided_slice %10 {offsets = [0, 96], sizes = [8, 32], strides = [1, 1]} : vector<8x128xbf16> to vector<8x32xbf16>
    %c96 = arith.constant 96 : index
    %c0_25 = arith.constant 0 : index
    %87 = vector.load %arg4[%c96, %c0_25] : memref<128x32xbf16, #tpu.memory_space<vmem>>, vector<32x32xbf16>
    %88 = vector.shape_cast %84 : vector<8x32xbf16> to vector<1x8x32xbf16>
    %89 = vector.shape_cast %85 : vector<8x32xbf16> to vector<1x8x32xbf16>
    %90 = vector.shape_cast %86 : vector<8x32xbf16> to vector<1x8x32xbf16>
    %cst_26 = arith.constant dense<0.000000e+00> : vector<1x8x8xf32>
    %91 = tpu.matmul %89, %88, %cst_26 {dimension_numbers = #tpu.dot_dimension_numbers<[2], [2], [1], [1], [0, 0, 0, 1, 1, 1], [0], [0]>} : vector<1x8x32xbf16>, vector<1x8x32xbf16>, vector<1x8x8xf32> -> vector<1x8x8xf32>
    %cst_27 = arith.constant dense<0xFF800000> : vector<1x8xf32>
    %92 = vector.multi_reduction <maximumf>, %91, %cst_27 [2] : vector<1x8x8xf32> to vector<1x8xf32>
    %93 = vector.shape_cast %92 : vector<1x8xf32> to vector<1x8x1xf32>
    %94 = vector.broadcast %93 : vector<1x8x1xf32> to vector<1x8x8xf32>
    %95 = arith.subf %91, %94 : vector<1x8x8xf32>
    %96 = math.exp %95 : vector<1x8x8xf32>
    %cst_28 = arith.constant dense<0.000000e+00> : vector<1x8xf32>
    %97 = vector.multi_reduction <add>, %96, %cst_28 [2] : vector<1x8x8xf32> to vector<1x8xf32>
    %98 = vector.shape_cast %97 : vector<1x8xf32> to vector<1x8x1xf32>
    %99 = tpu.reciprocal %98 {approx = true} : vector<1x8x1xf32> -> vector<1x8x1xf32>
    %100 = vector.broadcast %99 : vector<1x8x1xf32> to vector<1x8x8xf32>
    %101 = arith.mulf %96, %100 : vector<1x8x8xf32>
    %102 = arith.truncf %101 : vector<1x8x8xf32> to vector<1x8x8xbf16>
    %cst_29 = arith.constant dense<0.000000e+00> : vector<1x8x32xf32>
    %103 = tpu.matmul %102, %90, %cst_29 {dimension_numbers = #tpu.dot_dimension_numbers<[2], [1], [1], [2], [0, 0, 0, 1, 1, 2], [0], [0]>} : vector<1x8x8xbf16>, vector<1x8x32xbf16>, vector<1x8x32xf32> -> vector<1x8x32xf32>
    %104 = vector.shape_cast %103 : vector<1x8x32xf32> to vector<8x32xf32>
    %105 = arith.truncf %104 : vector<8x32xf32> to vector<8x32xbf16>
    %cst_30 = arith.constant dense<0.000000e+00> : vector<8x32xf32>
    %106 = tpu.matmul %105, %87, %cst_30 {dimension_numbers = #tpu.dot_dimension_numbers<[1], [0], [0], [1], [0, 0, 1, 1], [], []>} : vector<8x32xbf16>, vector<32x32xbf16>, vector<8x32xf32> -> vector<8x32xf32>
    %107 = arith.addf %83, %106 : vector<8x32xf32>
    %c0_31 = arith.constant 0 : index
    %c0_32 = arith.constant 0 : index
    %108 = vector.load %arg8[%c0_31, %c0_32] : memref<6x32xf32, #tpu.memory_space<vmem>>, vector<1x32xf32>
    %c1 = arith.constant 1 : index
    %c0_33 = arith.constant 0 : index
    %109 = vector.load %arg8[%c1, %c0_33] : memref<6x32xf32, #tpu.memory_space<vmem>>, vector<1x32xf32>
    %c2 = arith.constant 2 : index
    %c0_34 = arith.constant 0 : index
    %110 = vector.load %arg8[%c2, %c0_34] : memref<6x32xf32, #tpu.memory_space<vmem>>, vector<1x32xf32>
    %c3 = arith.constant 3 : index
    %c0_35 = arith.constant 0 : index
    %111 = vector.load %arg8[%c3, %c0_35] : memref<6x32xf32, #tpu.memory_space<vmem>>, vector<1x32xf32>
    %c4 = arith.constant 4 : index
    %c0_36 = arith.constant 0 : index
    %112 = vector.load %arg8[%c4, %c0_36] : memref<6x32xf32, #tpu.memory_space<vmem>>, vector<1x32xf32>
    %c5 = arith.constant 5 : index
    %c0_37 = arith.constant 0 : index
    %113 = vector.load %arg8[%c5, %c0_37] : memref<6x32xf32, #tpu.memory_space<vmem>>, vector<1x32xf32>
    %114 = vector.broadcast %108 : vector<1x32xf32> to vector<8x32xf32>
    %115 = arith.addf %107, %114 : vector<8x32xf32>
    %116 = arith.addf %115, %0 : vector<8x32xf32>
    %cst_38 = arith.constant dense<0.000000e+00> : vector<8xf32>
    %117 = vector.multi_reduction <add>, %116, %cst_38 [1] : vector<8x32xf32> to vector<8xf32>
    %118 = vector.shape_cast %117 : vector<8xf32> to vector<8x1xf32>
    %cst_39 = arith.constant 3.200000e+01 : f32
    %119 = vector.broadcast %cst_39 : f32 to vector<8x1xf32>
    %120 = arith.divf %118, %119 : vector<8x1xf32>
    %121 = vector.broadcast %120 : vector<8x1xf32> to vector<8x32xf32>
    %122 = arith.subf %116, %121 : vector<8x32xf32>
    %123 = arith.mulf %122, %122 : vector<8x32xf32>
    %cst_40 = arith.constant dense<0.000000e+00> : vector<8xf32>
    %124 = vector.multi_reduction <add>, %123, %cst_40 [1] : vector<8x32xf32> to vector<8xf32>
    %125 = vector.shape_cast %124 : vector<8xf32> to vector<8x1xf32>
    %cst_41 = arith.constant 3.200000e+01 : f32
    %126 = vector.broadcast %cst_41 : f32 to vector<8x1xf32>
    %127 = arith.divf %125, %126 : vector<8x1xf32>
    %128 = vector.broadcast %120 : vector<8x1xf32> to vector<8x32xf32>
    %129 = arith.subf %116, %128 : vector<8x32xf32>
    %cst_42 = arith.constant 9.99999974E-6 : f32
    %130 = vector.broadcast %cst_42 : f32 to vector<8x1xf32>
    %131 = arith.addf %127, %130 : vector<8x1xf32>
    %132 = math.rsqrt %131 : vector<8x1xf32>
    %133 = vector.broadcast %132 : vector<8x1xf32> to vector<8x32xf32>
    %134 = arith.mulf %129, %133 : vector<8x32xf32>
    %135 = vector.broadcast %109 : vector<1x32xf32> to vector<8x32xf32>
    %136 = arith.mulf %134, %135 : vector<8x32xf32>
    %137 = vector.broadcast %110 : vector<1x32xf32> to vector<8x32xf32>
    %138 = arith.addf %136, %137 : vector<8x32xf32>
    %139 = arith.truncf %138 : vector<8x32xf32> to vector<8x32xbf16>
    %c0_43 = arith.constant 0 : index
    %c0_44 = arith.constant 0 : index
    %140 = vector.load %arg5[%c0_43, %c0_44] : memref<32x128xbf16, #tpu.memory_space<vmem>>, vector<32x128xbf16>
    %cst_45 = arith.constant dense<0.000000e+00> : vector<8x128xf32>
    %141 = tpu.matmul %139, %140, %cst_45 {dimension_numbers = #tpu.dot_dimension_numbers<[1], [0], [0], [1], [0, 0, 1, 1], [], []>} : vector<8x32xbf16>, vector<32x128xbf16>, vector<8x128xf32> -> vector<8x128xf32>
    %c0_46 = arith.constant 0 : index
    %c0_47 = arith.constant 0 : index
    %142 = vector.load %arg6[%c0_46, %c0_47] : memref<1x128xf32, #tpu.memory_space<vmem>>, vector<1x128xf32>
    %143 = vector.broadcast %142 : vector<1x128xf32> to vector<8x128xf32>
    %144 = arith.addf %141, %143 : vector<8x128xf32>
    %cst_48 = arith.constant 0.000000e+00 : f32
    %145 = vector.broadcast %cst_48 : f32 to vector<8x128xf32>
    %146 = arith.maximumf %144, %145 : vector<8x128xf32>
    %147 = arith.truncf %146 : vector<8x128xf32> to vector<8x128xbf16>
    %c0_49 = arith.constant 0 : index
    %c0_50 = arith.constant 0 : index
    %148 = vector.load %arg7[%c0_49, %c0_50] : memref<128x32xbf16, #tpu.memory_space<vmem>>, vector<128x32xbf16>
    %cst_51 = arith.constant dense<0.000000e+00> : vector<8x32xf32>
    %149 = tpu.matmul %147, %148, %cst_51 {dimension_numbers = #tpu.dot_dimension_numbers<[1], [0], [0], [1], [0, 0, 1, 1], [], []>} : vector<8x128xbf16>, vector<128x32xbf16>, vector<8x32xf32> -> vector<8x32xf32>
    %150 = vector.broadcast %111 : vector<1x32xf32> to vector<8x32xf32>
    %151 = arith.addf %149, %150 : vector<8x32xf32>
    %152 = arith.addf %151, %138 : vector<8x32xf32>
    %cst_52 = arith.constant dense<0.000000e+00> : vector<8xf32>
    %153 = vector.multi_reduction <add>, %152, %cst_52 [1] : vector<8x32xf32> to vector<8xf32>
    %154 = vector.shape_cast %153 : vector<8xf32> to vector<8x1xf32>
    %cst_53 = arith.constant 3.200000e+01 : f32
    %155 = vector.broadcast %cst_53 : f32 to vector<8x1xf32>
    %156 = arith.divf %154, %155 : vector<8x1xf32>
    %157 = vector.broadcast %156 : vector<8x1xf32> to vector<8x32xf32>
    %158 = arith.subf %152, %157 : vector<8x32xf32>
    %159 = arith.mulf %158, %158 : vector<8x32xf32>
    %cst_54 = arith.constant dense<0.000000e+00> : vector<8xf32>
    %160 = vector.multi_reduction <add>, %159, %cst_54 [1] : vector<8x32xf32> to vector<8xf32>
    %161 = vector.shape_cast %160 : vector<8xf32> to vector<8x1xf32>
    %cst_55 = arith.constant 3.200000e+01 : f32
    %162 = vector.broadcast %cst_55 : f32 to vector<8x1xf32>
    %163 = arith.divf %161, %162 : vector<8x1xf32>
    %164 = vector.broadcast %156 : vector<8x1xf32> to vector<8x32xf32>
    %165 = arith.subf %152, %164 : vector<8x32xf32>
    %cst_56 = arith.constant 9.99999974E-6 : f32
    %166 = vector.broadcast %cst_56 : f32 to vector<8x1xf32>
    %167 = arith.addf %163, %166 : vector<8x1xf32>
    %168 = math.rsqrt %167 : vector<8x1xf32>
    %169 = vector.broadcast %168 : vector<8x1xf32> to vector<8x32xf32>
    %170 = arith.mulf %165, %169 : vector<8x32xf32>
    %171 = vector.broadcast %112 : vector<1x32xf32> to vector<8x32xf32>
    %172 = arith.mulf %170, %171 : vector<8x32xf32>
    %173 = vector.broadcast %113 : vector<1x32xf32> to vector<8x32xf32>
    %174 = arith.addf %172, %173 : vector<8x32xf32>
    %c0_57 = arith.constant 0 : index
    %c0_58 = arith.constant 0 : index
    %175 = vector.load %arg9[%c0_57, %c0_58] : memref<8x32xf32, #tpu.memory_space<vmem>>, vector<8x32xf32>
    tpu.vector_store %arg9[%c0_57, %c0_58], %174 {strides = array<i32>} : memref<8x32xf32, #tpu.memory_space<vmem>>, vector<8x32xf32>,
    return
  }
  func.func @transform_0(%arg0: i32) -> (i32, i32) {
    %c0_i32 = arith.constant 0 : i32
    %c0_i32_0 = arith.constant 0 : i32
    return %arg0, %c0_i32 : i32, i32
  }
  func.func @transform_1(%arg0: i32) -> (i32, i32) {
    %c0_i32 = arith.constant 0 : i32
    %c0_i32_0 = arith.constant 0 : i32
    %c0_i32_1 = arith.constant 0 : i32
    return %c0_i32, %c0_i32_0 : i32, i32
  }
  func.func @transform_2(%arg0: i32) -> (i32, i32) {
    %c0_i32 = arith.constant 0 : i32
    %c0_i32_0 = arith.constant 0 : i32
    %c0_i32_1 = arith.constant 0 : i32
    return %c0_i32, %c0_i32_0 : i32, i32
  }
  func.func @transform_3(%arg0: i32) -> (i32, i32) {
    %c0_i32 = arith.constant 0 : i32
    %c0_i32_0 = arith.constant 0 : i32
    %c0_i32_1 = arith.constant 0 : i32
    return %c0_i32, %c0_i32_0 : i32, i32
  }
  func.func @transform_4(%arg0: i32) -> (i32, i32) {
    %c0_i32 = arith.constant 0 : i32
    %c0_i32_0 = arith.constant 0 : i32
    %c0_i32_1 = arith.constant 0 : i32
    return %c0_i32, %c0_i32_0 : i32, i32
  }
  func.func @transform_5(%arg0: i32) -> (i32, i32) {
    %c0_i32 = arith.constant 0 : i32
    %c0_i32_0 = arith.constant 0 : i32
    %c0_i32_1 = arith.constant 0 : i32
    return %c0_i32, %c0_i32_0 : i32, i32
  }
  func.func @transform_6(%arg0: i32) -> (i32, i32) {
    %c0_i32 = arith.constant 0 : i32
    %c0_i32_0 = arith.constant 0 : i32
    %c0_i32_1 = arith.constant 0 : i32
    return %c0_i32, %c0_i32_0 : i32, i32
  }
  func.func @transform_7(%arg0: i32) -> (i32, i32) {
    %c0_i32 = arith.constant 0 : i32
    %c0_i32_0 = arith.constant 0 : i32
    %c0_i32_1 = arith.constant 0 : i32
    return %c0_i32, %c0_i32_0 : i32, i32
  }
  func.func @transform_8(%arg0: i32) -> (i32, i32) {
    %c0_i32 = arith.constant 0 : i32
    %c0_i32_0 = arith.constant 0 : i32
    return %arg0, %c0_i32 : i32, i32
  }
}

</mosaic_0001>

<bundles_post_ra>
// kernel: tpu_custom_call.1
= control target key start
LH: loop header
LB: loop body
LE: loop exit
PB: predicated region body
PF: predicated region fallthrough
CT: control target
= control target key end

     0   :  { %s2884_s0 = inlined_call_operand.hbm [shape: f32[16,32], index: 0, kind: input, shape index: {}]   ;;  %s2885_s1 = inlined_call_operand.hbm [shape: bf16[32,384], index: 1, kind: input, shape index: {}]   ;;  %s2886_s2 = inlined_call_operand.hbm [shape: f32[1,384], index: 2, kind: input, shape index: {}]   ;;  %s2887_s3 = inlined_call_operand.hbm [shape: bf16[128,32], index: 3, kind: input, shape index: {}]   ;;  %s2888_s4 = inlined_call_operand.hbm [shape: bf16[32,128], index: 4, kind: input, shape index: {}]   ;;  %s2889_s5 = inlined_call_operand.hbm [shape: f32[1,128], index: 5, kind: input, shape index: {}]   ;;  %s2890_s6 = inlined_call_operand.hbm [shape: bf16[128,32], index: 6, kind: input, shape index: {}]   ;;  %s2891_s7 = inlined_call_operand.hbm [shape: f32[6,32], index: 7, kind: input, shape index: {}]   ;;  %s2892_s8 = inlined_call_operand.hbm [shape: f32[16,32], index: 8, kind: output, shape index: {}]  }
   0x1   :  { %2898 = sst [smem:[#allocation23_spill]] %s2885_s1 }
   0x2   :  { %13 = vsyncpa [#allocation3], 0 }
   0x3   :  { %15 = vsyncpa [#allocation3 + $0x1], 0 }
   0x4   :  { %16 = vsyncpa [#allocation6], 0 }
   0x5   :  { %17 = vsyncpa [#allocation9], 0 }
   0x6   :  { %18 = vsyncpa [#allocation12], 0 }
   0x7   :  { %19 = vsyncpa [#allocation15], 0 }
   0x8   :  { %20 = vsyncpa [#allocation4], 0 }
   0x9   :  { %22 = vsyncpa [#allocation4 + $0x1], 0  ;;  %s2413_s27 = smov 0   ;;  %s2415_s28 = smov 0  }
   0xa   :  { %s2417_s29 = smov 0   ;;  %s2419_s30 = smov 0  }
   0xb LB: > { %s2349_s9 = smov [#allocation5]   ;;  %s2434_s11 = sadd.s32 4294967295, %s2347_s30   ;;  %s2347_s30 = sphi %s2419_s30, %s2924_s30   ;;  %s2343_s29 = sphi %s2417_s29, %s2923_s29   ;;  %s2339_s28 = sphi %s2415_s28, %s2922_s28   ;;  %s2335_s27 = sphi %s2413_s27, %s2921_s27  }
   0xc   : > { %s244_s10 = sshll.u32 %s2349_s9, 4  ;;  %p1636_p0 = scmp.ge.s32.totalorder %s2347_s30, 1  ;;  %s2439_s10 = int_to_ptr.vmem [resolvable:$true] %s244_s10 }
   0xd   : > { %p2893_p1 = scmp.eq.s32.totalorder %s2434_s11, 0  ;;  %p232_p2 = scmp.lt.s32.totalorder %s2347_s30, 3 }
   0xe   : > { %s2350_s13 = smov [#allocation8]   ;;  %s2351_s16 = smov [#allocation11]  }
   0xf   : > { %p2441_p3 = pnand %p1636_p0, %p232_p2  ;;  %s268_s14 = sshll.u32 %s2350_s13, 4  ;;  %s2454_s14 = int_to_ptr.vmem [resolvable:$true] %s268_s14 }
  0x10   : > { %s2456_s17 = sshll.u32 %s2351_s16, 4  ;;  %s2901_s1 = sld [smem:[#allocation23_spill]]  ;;  %s296_s17 = int_to_ptr.vmem [resolvable:$true] %s2456_s17 }
  0x11   : > { %s2899_s12 = scalar_select %p2441_p3, 1, 0 }
  0x12   : > { %p1898_p5 = pneg %p2441_p3 }
  0x14   : > { %p2450_p6 = pnand %p1898_p5, %p2893_p1 }
  0x16   : > { %s2039_s20 = scalar_lea.hbm %s2901_s1, 768  ;;  %p2466_p8 = pneg %p2450_p6 }
  0x17   : > { %p2040_p7 = scmp.ne.s32.totalorder %s2901_s1, %s2039_s20  ;;  %p2046_p11 = scmp.lt.u32.totalorder %s2039_s20, %s2901_s1 }
  0x19   : > { %p2042_p9 = pnand %p2466_p8, %p2040_p7 }
  0x1b   : > { %p2043_p10 = pneg %p2042_p9 }
  0x1d   : > { %p2048_p12 = pnand %p2046_p11, %p2043_p10 }
  0x1f   : > { %2051 = shalt.err (!%p2048_p12)
}
  0x20   : > { %s2052_s26 = scalar_lea.vmem %s2439_s10, 768  ;;  %p2060_p5 = scmp.lt.s32.totalorder %s2439_s10, %s2439_s10 }
  0x21   : > { %p2053_p13 = scmp.ne.s32.totalorder %s2439_s10, %s2052_s26  ;;  %p2061_p4 = scmp.lt.s32.totalorder %s2052_s26, %s2052_s26 }
  0x23   : > { %p2055_p0 = pnand %p2053_p13, %p2466_p8  ;;  %p2062_p7 = por %p2061_p4, %p2060_p5 }
  0x25   : > { %p2056_p2 = pneg %p2055_p0 }
  0x27   : > { %p2063_p9 = pnand %p2062_p7, %p2056_p2 }
  0x29   : > { %2066 = shalt.err (!%p2063_p9)
}
  0x2a   : > { %s2352_s9 = smov 192   ;;  %s2353_s13 = smov 12  }
  0x2b   : > { %1901 = dma.hbm_to_vmem [thread:$0]  (!%p2450_p6), %s2901_s1, 768, %s2439_s10, [#allocation6], %s2352_s9, %s2352_s9, %s2353_s13  }
  0x2c   : > { %s2067_s21 = scalar_lea.hbm %s2887_s3, 1024 }
  0x2d   : > { %p2068_p4 = scmp.ne.s32.totalorder %s2887_s3, %s2067_s21  ;;  %p2074_p12 = scmp.lt.u32.totalorder %s2067_s21, %s2887_s3 }
  0x2f   : > { %p2070_p10 = pnand %p2068_p4, %p2466_p8 }
  0x31   : > { %p2071_p11 = pneg %p2070_p10 }
  0x33   : > { %p2076_p13 = pnand %p2074_p12, %p2071_p11 }
  0x35   : > { %2079 = shalt.err (!%p2076_p13)
}
  0x36   : > { %s2080_s10 = scalar_lea.vmem %s2454_s14, 1024  ;;  %p2088_p7 = scmp.lt.s32.totalorder %s2454_s14, %s2454_s14 }
  0x37   : > { %p2081_p0 = scmp.ne.s32.totalorder %s2454_s14, %s2080_s10  ;;  %p2089_p9 = scmp.lt.s32.totalorder %s2080_s10, %s2080_s10 }
  0x39   : > { %p2083_p2 = pnand %p2081_p0, %p2466_p8  ;;  %p2090_p4 = por %p2089_p9, %p2088_p7 }
  0x3b   : > { %p2084_p5 = pneg %p2083_p2 }
  0x3d   : > { %p2091_p10 = pnand %p2090_p4, %p2084_p5 }
  0x3f   : > { %2094 = shalt.err (!%p2091_p10)
}
  0x40   : > { %s2895_s9 = smov 64   ;;  %s2355_s13 = smov 4  }
  0x41   : > { %1907 = dma.hbm_to_vmem [thread:$0]  (!%p2450_p6), %s2887_s3, 1024, %s2454_s14, [#allocation9], %s2895_s9, %s2895_s9, %s2355_s13  }
  0x42   : > { %s2095_s21 = scalar_lea.hbm %s2889_s5, 16 }
  0x43   : > { %p2096_p11 = scmp.ne.s32.totalorder %s2889_s5, %s2095_s21  ;;  %p2102_p0 = scmp.lt.u32.totalorder %s2095_s21, %s2889_s5 }
  0x45   : > { %p2098_p12 = pnand %p2096_p11, %p2466_p8 }
  0x47   : > { %p2099_p13 = pneg %p2098_p12 }
  0x49   : > { %p2104_p2 = pnand %p2102_p0, %p2099_p13 }
  0x4b   : > { %2107 = shalt.err (!%p2104_p2)
}
  0x4c   : > { %s2108_s10 = scalar_lea.vmem %s296_s17, 16  ;;  %s2115_s14 = scalar_lea.vmem %s296_s17, 32 }
  0x4d   : > { %p2109_p5 = scmp.ne.s32.totalorder %s296_s17, %s2108_s10  ;;  %p2116_p4 = scmp.lt.s32.totalorder %s296_s17, %s296_s17 }
  0x4e   : > { %p2117_p10 = scmp.lt.s32.totalorder %s2115_s14, %s2108_s10 }
  0x4f   : > { %p2111_p7 = pnand %p2109_p5, %p2466_p8 }
  0x50   : > { %p2118_p1 = por %p2117_p10, %p2116_p4 }
  0x51   : > { %p2112_p9 = pneg %p2111_p7 }
  0x53   : > { %p2119_p3 = pnand %p2118_p1, %p2112_p9 }
  0x55   : > { %2122 = shalt.err (!%p2119_p3)
}
  0x56   : > { %1913 = dma.hbm_to_vmem [thread:$0]  (!%p2450_p6), %s2889_s5, 16, %s296_s17, [#allocation12]  }
  0x57   : > { %s2356_s19 = smov [#allocation7]   ;;  %s2357_s21 = smov [#allocation10]  }
  0x58   : > { %s258_s20 = sshll.u32 %s2356_s19, 4  ;;  %s281_s22 = sshll.u32 %s2357_s21, 4  ;;  %s259_s20 = int_to_ptr.vmem [resolvable:$true] %s258_s20  ;;  %s282_s22 = int_to_ptr.vmem [resolvable:$true] %s281_s22 }
  0x59   : > { %s2123_s26 = scalar_lea.hbm %s2886_s2, 48 }
  0x5a   : > { %p2124_p1 = scmp.ne.s32.totalorder %s2886_s2, %s2123_s26  ;;  %p2130_p12 = scmp.lt.u32.totalorder %s2123_s26, %s2886_s2 }
  0x5c   : > { %p2126_p3 = pnand %p2124_p1, %p2466_p8 }
  0x5e   : > { %p2127_p11 = pneg %p2126_p3 }
  0x60   : > { %p2132_p13 = pnand %p2130_p12, %p2127_p11 }
  0x62   : > { %2135 = shalt.err (!%p2132_p13)
}
  0x63   : > { %s2136_s17 = scalar_lea.vmem %s259_s20, 48  ;;  %s2143_s18 = scalar_lea.vmem %s259_s20, 64 }
  0x64   : > { %p2137_p0 = scmp.ne.s32.totalorder %s259_s20, %s2136_s17  ;;  %p2144_p7 = scmp.lt.s32.totalorder %s259_s20, %s259_s20 }
  0x65   : > { %p2145_p9 = scmp.lt.s32.totalorder %s2143_s18, %s2136_s17 }
  0x66   : > { %p2139_p2 = pnand %p2137_p0, %p2466_p8 }
  0x67   : > { %p2146_p4 = por %p2145_p9, %p2144_p7 }
  0x68   : > { %p2140_p5 = pneg %p2139_p2 }
  0x6a   : > { %p2147_p10 = pnand %p2146_p4, %p2140_p5 }
  0x6c   : > { %2150 = shalt.err (!%p2147_p10)
}
  0x6d   : > { %1904 = dma.hbm_to_vmem [thread:$0]  (!%p2450_p6), %s2886_s2, 48, %s259_s20, [#allocation6]  }
  0x6e   : > { %s2151_s25 = scalar_lea.hbm %s2888_s4, 256 }
  0x6f   : > { %p2152_p1 = scmp.ne.s32.totalorder %s2888_s4, %s2151_s25  ;;  %p2158_p12 = scmp.lt.u32.totalorder %s2151_s25, %s2888_s4 }
  0x71   : > { %p2154_p3 = pnand %p2152_p1, %p2466_p8 }
  0x73   : > { %p2155_p11 = pneg %p2154_p3 }
  0x75   : > { %p2160_p13 = pnand %p2158_p12, %p2155_p11 }
  0x77   : > { %2163 = shalt.err (!%p2160_p13)
}
  0x78   : > { %s2164_s17 = scalar_lea.vmem %s282_s22, 256  ;;  %p2172_p7 = scmp.lt.s32.totalorder %s282_s22, %s282_s22 }
  0x79   : > { %p2165_p0 = scmp.ne.s32.totalorder %s282_s22, %s2164_s17  ;;  %p2173_p9 = scmp.lt.s32.totalorder %s2164_s17, %s2164_s17 }
  0x7b   : > { %p2167_p2 = pnand %p2165_p0, %p2466_p8  ;;  %p2174_p4 = por %p2173_p9, %p2172_p7 }
  0x7d   : > { %p2168_p5 = pneg %p2167_p2 }
  0x7f   : > { %p2175_p10 = pnand %p2174_p4, %p2168_p5 }
  0x81   : > { %2178 = shalt.err (!%p2175_p10)
}
  0x82   : > { %s2903_s20 = smov 64   ;;  %s2358_s21 = smov [#allocation13]  }
  0x83   : > { %1910 = dma.hbm_to_vmem [thread:$0]  (!%p2450_p6), %s2888_s4, 256, %s282_s22, [#allocation9], %s2903_s20, %s2903_s20, %s2355_s13  }
  0x84   : > { %s305_s9 = sshll.u32 %s2358_s21, 4  ;;  %s2359_s24 = smov [#allocation14]   ;;  %s306_s9 = int_to_ptr.vmem [resolvable:$true] %s305_s9 }
  0x85   : > { %s319_s25 = sshll.u32 %s2359_s24, 4  ;;  %s2179_s14 = scalar_lea.hbm %s2890_s6, 1024  ;;  %s320_s25 = int_to_ptr.vmem [resolvable:$true] %s319_s25 }
  0x86   : > { %p2180_p1 = scmp.ne.s32.totalorder %s2890_s6, %s2179_s14  ;;  %p2186_p12 = scmp.lt.u32.totalorder %s2179_s14, %s2890_s6 }
  0x88   : > { %p2182_p3 = pnand %p2180_p1, %p2466_p8 }
  0x8a   : > { %p2183_p11 = pneg %p2182_p3 }
  0x8c   : > { %p2188_p13 = pnand %p2186_p12, %p2183_p11 }
  0x8e   : > { %2191 = shalt.err (!%p2188_p13)
}
  0x8f   : > { %s2192_s22 = scalar_lea.vmem %s306_s9, 1024  ;;  %p2200_p7 = scmp.lt.s32.totalorder %s306_s9, %s306_s9 }
  0x90   : > { %p2193_p0 = scmp.ne.s32.totalorder %s306_s9, %s2192_s22  ;;  %p2201_p9 = scmp.lt.s32.totalorder %s2192_s22, %s2192_s22 }
  0x92   : > { %p2195_p2 = pnand %p2193_p0, %p2466_p8  ;;  %p2202_p4 = por %p2201_p9, %p2200_p7 }
  0x94   : > { %p2196_p5 = pneg %p2195_p2 }
  0x96   : > { %p2203_p10 = pnand %p2202_p4, %p2196_p5 }
  0x98   : > { %2206 = shalt.err (!%p2203_p10)
}
  0x99   : > { %1916 = dma.hbm_to_vmem [thread:$0]  (!%p2450_p6), %s2890_s6, 1024, %s306_s9, [#allocation12], %s2903_s20, %s2903_s20, %s2355_s13  }
  0x9a   : > { %s2207_s26 = scalar_lea.hbm %s2891_s7, 128 }
  0x9b   : > { %p2208_p1 = scmp.ne.s32.totalorder %s2891_s7, %s2207_s26  ;;  %p2214_p12 = scmp.lt.u32.totalorder %s2207_s26, %s2891_s7 }
  0x9d   : > { %p2210_p3 = pnand %p2208_p1, %p2466_p8 }
  0x9f   : > { %p2211_p11 = pneg %p2210_p3 }
  0xa1   : > { %p2216_p13 = pnand %p2214_p12, %p2211_p11 }
  0xa3   : > { %2219 = shalt.err (!%p2216_p13)
}
  0xa4   : > { %s2220_s18 = scalar_lea.vmem %s320_s25, 128  ;;  %p2228_p7 = scmp.lt.s32.totalorder %s320_s25, %s320_s25 }
  0xa5   : > { %p2221_p0 = scmp.ne.s32.totalorder %s320_s25, %s2220_s18  ;;  %p2229_p9 = scmp.lt.s32.totalorder %s2220_s18, %s2220_s18 }
  0xa7   : > { %p2223_p2 = pnand %p2221_p0, %p2466_p8  ;;  %p2230_p4 = por %p2229_p9, %p2228_p7 }
  0xa9   : > { %p2224_p5 = pneg %p2223_p2 }
  0xab   : > { %p2231_p10 = pnand %p2230_p4, %p2224_p5 }
  0xad   : > { %2234 = shalt.err (!%p2231_p10)
}
  0xae   : > { %1919 = dma.hbm_to_vmem [thread:$0]  (!%p2450_p6), %s2891_s7, 128, %s320_s25, [#allocation15]  }
  0xaf   : > { %s1635_s23 = sadd.s32 4294967294, %s2347_s30   ;;  %s2612_s15 = sadd.s32 1, %s2347_s30  }
  0xb0   : > { %s35_s9 = sadd.s32 1, %s2343_s29  ;;  %s32_s22 = ssub.s32 %s2347_s30, %s2612_s15 }
  0xb1   : > { %p42_p8 = scmp.ne.s32.totalorder %s2343_s29, %s2339_s28  ;;  %p33_p1 = scmp.eq.s32.totalorder %s32_s22, 0 }
  0xb2   : > { %p43_p3 = scmp.eq.s32.totalorder %s2347_s30, 0  ;;  %p48_p11 = scmp.ne.s32.totalorder %s2339_s28, %s2335_s27 }
  0xb3   : > { %p219_p12 = scmp.eq.s32.totalorder %s2434_s11, 1  ;;  %p2904_p0 = scmp.eq.s32.totalorder %s2434_s11, 0 }
  0xb4   : > { %s2624_s1 = scalar_select %p33_p1, %s2343_s29, %s35_s9  }
  0xb5   : > { %p44_p13 = por %p43_p3, %p42_p8  ;;  %p2628_p2 = por %p2904_p0, %p48_p11 }
  0xb6   : > { %p2632_p6 = por %p219_p12, %p42_p8  ;;  %p225_p5 = scmp.eq.s32.totalorder %s1635_s23, 1 }
  0xb7   : > { %p1935_p7 = scmp.lt.s32.totalorder %s2347_s30, 2  ;;  %s330_s21 = sand.u32 1, %s2343_s29  }
  0xb8   : > { %s2906_s25 = scalar_select %p2632_p6, 1, 0 }
  0xb9   : > { %p2638_p9 = por %p225_p5, %p48_p11  ;;  %s1645_s26 = sshll.u32 %s330_s21, 3 }
  0xba   : > { %s1646_s10 = sshll.u32 %s2347_s30, 7  ;;  %s334_s18 = scalar_lea.vmem [#allocation2], %s1645_s26 }
  0xbb   : > { %s2907_s24 = scalar_select %p2638_p9, 1, 0 }
  0xbc   : > { %s2646_s17 = scalar_lea.hbm %s2884_s0, %s1646_s10  ;;  %s341_s13 = sshll.u32 %s334_s18, 4  ;;  %s2652_s13 = int_to_ptr.vmem [resolvable:$true] %s341_s13 }
  0xbd   : > { %p2648_p4 = pnand %p1935_p7, %p44_p13  ;;  %s331_s23 = scalar_lea.sflag [#allocation3], %s330_s21 }
  0xbe   : > { %s2235_s9 = scalar_lea.hbm %s2646_s17, 128  ;;  %s2240_s10 = scalar_lea.hbm %s2884_s0, 256 }
  0xbf   : > { %p2236_p10 = scmp.ne.s32.totalorder %s2646_s17, %s2235_s9  ;;  %p2237_p8 = pneg %p2648_p4 }
  0xc0   : > { %p2241_p11 = scmp.lt.u32.totalorder %s2646_s17, %s2884_s0  ;;  %p2242_p12 = scmp.lt.u32.totalorder %s2240_s10, %s2235_s9 }
  0xc1   : > { %p2238_p1 = pnand %p2237_p8, %p2236_p10  ;;  %p2244_p0 = scmp.lt.u32.totalorder %s2235_s9, %s2646_s17 }
  0xc2   : > { %p2243_p13 = por %p2242_p12, %p2241_p11 }
  0xc3   : > { %p2239_p3 = pneg %p2238_p1 }
  0xc4   : > { %p2245_p5 = por %p2244_p0, %p2243_p13 }
  0xc6   : > { %p2246_p7 = pnand %p2245_p5, %p2239_p3 }
  0xc8   : > { %2249 = shalt.err (!%p2246_p7)
}
  0xc9   : > { %s2250_s21 = scalar_lea.vmem %s2652_s13, 128  ;;  %s2360_s18 = smov [#allocation2]  }
  0xca   : > { %p2251_p10 = scmp.ne.s32.totalorder %s2652_s13, %s2250_s21  ;;  %s2255_s22 = sshll.u32 %s2360_s18, 4  ;;  %s2256_s22 = int_to_ptr.vmem [resolvable:$false] %s2255_s22 }
  0xcb   : > { %s2257_s26 = scalar_lea.vmem %s2256_s22, 256  ;;  %p2258_p6 = scmp.lt.s32.totalorder %s2652_s13, %s2256_s22 }
  0xcc   : > { %p2253_p1 = pnand %p2251_p10, %p2237_p8  ;;  %p2259_p11 = scmp.lt.s32.totalorder %s2257_s26, %s2250_s21 }
  0xce   : > { %p2254_p9 = pneg %p2253_p1  ;;  %p2260_p12 = por %p2259_p11, %p2258_p6 }
  0xd0   : > { %p2261_p13 = pnand %p2260_p12, %p2254_p9 }
  0xd2   : > { %2264 = shalt.err (!%p2261_p13)
}
  0xd3   : > { %1923 = dma.hbm_to_vmem [thread:$0]  (!%p2648_p4), %s2646_s17, 128, %s2652_s13, %s331_s23  }
  0xd4   : > { %p2909_p3 = scmp.ne.s32.totalorder %s2899_s12, 0 }
  0xd5   : > { %s2682_s9 = sand.u32 (!%p2909_p3), 1, %s2339_s28  }
  0xd6   : > { %350 = sbr.rel (%p2909_p3) target bundleno = 3905 (0xf41), region = 52  ;;  %s1648_s10 = sshll.u32 (!%p2909_p3), %s2682_s9, 3 }
  0xd7   : > { %s353_s14 = scalar_lea.sflag (!%p2909_p3), [#allocation3], %s2682_s9  ;;  %s356_s16 = scalar_lea.vmem (!%p2909_p3), [#allocation2], %s1648_s10 }
  0xdd   : > { %2310 = dma.done.wait (%p2628_p2), %s353_s14, 128  }
  0xde   : > { %2312 = vsyncadd (%p2628_p2), %s353_s14, 4294967168  ;;  %p2910_p6 = scmp.eq.s32.totalorder %s2434_s11, 0 }
  0xe0   : > { %2314 = dma.done.wait (%p2910_p6), [#allocation6], 816   ;;  %p2911_p9 = pmov %p2910_p6 }
  0xe1   : > { %p2912_p4 = pmov %p2910_p6 }
  0xe2   : > { %2316 = vsyncadd (%p2911_p9), [#allocation6], 4294966480 }
  0xe3   : > { %2318 = dma.done.wait (%p2912_p4), [#allocation9], 1280   ;;  %p2913_p8 = pmov %p2912_p4 }
  0xe4   : > { %p2914_p0 = pmov %p2912_p4 }
  0xe5   : > { %2320 = vsyncadd (%p2913_p8), [#allocation9], 4294966016 }
  0xe6   : > { %2322 = dma.done.wait (%p2914_p0), [#allocation12], 1040   ;;  %p2915_p5 = pmov %p2914_p0 }
  0xe7   : > { %p2916_p2 = pmov %p2914_p0 }
  0xe8   : > { %2324 = vsyncadd (%p2915_p5), [#allocation12], 4294966256 }
  0xe9   : > { %2326 = dma.done.wait (%p2916_p2), [#allocation15], 128   ;;  %p2917_p7 = pmov %p2914_p0 }
  0xea   : > { %v2361_v0 = vmov 0   ;;  %v2362_v1 = vmov 0.0   ;;  %v1993_v2 = vld [vmem:[#allocation5 + $0x4] ss:$12 sps:$4 sm:$0xff]   ;;  %v1995_v3 = vld [vmem:[#allocation5] ss:$12 sps:$4 sm:$0xff]   ;;  %v430_v10 = vlaneseq }
  0xeb   : > { %2328 = vsyncadd (%p2917_p7), [#allocation15], 4294967168  ;;  %513 = vmatprep.mubr.bf16.mxu0 %v2361_v0  ;;  %1764 = vmatprep.subr.bf16.mxu1 %v2362_v1  ;;  %v1996_v4 = vld [vmem:[#allocation5 + $0x1c] ss:$12 sps:$4 sm:$0xff]   ;;  %v1998_v5 = vld [vmem:[#allocation5 + $0x18] ss:$12 sps:$4 sm:$0xff]  }
  0xec   : > { %481 = vmatprep.subr.bf16.mxu0 %v1993_v2  ;;  %v2709_v6 = vld [vmem:[%s356_s16] sm:$0xff]  ;;  %vm477_vm0 = vcmask 261120   ;;  %v2000_v9 = vld [vmem:[#allocation5 + $0x20] ss:$12 sps:$4 sm:$0xff]   ;;  %vm2363_vm1 = vmmov 0   ;;  %v431_v11 = vshrl.u32 %v430_v10, 7 }
  0xed   : > { %482 = vmatpush1.bf16.msra.mxu0 %v1995_v3  ;;  %v1999_v7 = vld [vmem:[#allocation5 + $0x8] ss:$12 sps:$4 sm:$0xff]   ;;  %v419_v8 = vpack.c.bf16 %v2709_v6, %v2709_v6  ;;  %1766 = vmatprep.mubr.msk.bf16.mxu1 %vm2363_vm1, %v2362_v1  ;;  %v428_v13 = vld [vmem:[#allocation7] sm:$0x7]  ;;  %s2364_s12 = smov 96   ;;  %vm631_vm2 = vcmask 1043456  }
  0xee   : > { %483 = vmatprep.subr.bf16.mxu0 %v1996_v4  ;;  %v432_v12 = vsub.s32 0, %v431_v11  ;;  %v436_v14 = vsub.s32 1, %v431_v11  ;;  %v440_v26 = vsub.s32 2, %v431_v11  ;;  %vm615_vm3 = vcmask 64512   ;;  %s2365_s19 = smov 64   ;;  %v2003_v62 = vld [vmem:[#allocation8 + $0x10] sm:$0xff]  }
  0xef   : > { %v2004_v63 = vld [vmem:[#allocation8 + $0x18] sm:$0xff]   ;;  %s2366_s17 = smov 32   ;;  %s1704_s13 = sshll.u32 %s2434_s11, 7 }
  0xf0   : > { %v433_v15 = vrot.slane %v428_v13, %v432_v12  ;;  %v437_v16 = vrot.slane %v428_v13, %v436_v14  ;;  %v441_v27 = vrot.slane %v428_v13, %v440_v26  ;;  %s416_s20 = scalar_lea.vmem [#allocation16], %s1648_s10  ;;  %s2839_s22 = scalar_lea.hbm %s2892_s8, %s1704_s13 }
  0xf1   : > { %484 = vmatpush1.bf16.msra.mxu0 %v1998_v5  ;;  %s1498_s23 = sshll.u32 %s416_s20, 4  ;;  %s1485_s26 = scalar_lea.sflag [#allocation4], %s2682_s9  ;;  %s2841_s23 = int_to_ptr.vmem [resolvable:$true] %s1498_s23 }
  0xf2   : > { %1750 = vmatprep.subr.bf16.mxu0 %v2362_v1  ;;  %s2265_s14 = scalar_lea.vmem %s2841_s23, 128  ;;  %p2918_p1 = scmp.ne.s32.totalorder %s2906_s25, 0 }
  0xf3   : > { %p2266_p10 = scmp.ne.s32.totalorder %s2841_s23, %s2265_s14  ;;  %s2367_s11 = smov [#allocation16]  }
  0xf4   : > { %1663 = vmatmul.mubr.msk.bf16.vlgmr.msra.gmra.mrb[0].mxu0 %vm477_vm0, %v419_v8  ;;  %s2269_s10 = sshll.u32 %s2367_s11, 4  ;;  %s2270_s10 = int_to_ptr.vmem [resolvable:$false] %s2269_s10 }
  0xf5   : > { %1751 = vmatpush3.bf16.msra.mxu0 %v1999_v7  ;;  %1754 = vmatprep.mubr.msk.bf16.mxu0 %vm2363_vm1, %v2362_v1  ;;  %v2001_v7 = vld [vmem:[#allocation8] sm:$0xff]   ;;  %p2267_p11 = pnand %p2266_p10, %p2918_p1  ;;  %s2271_s16 = scalar_lea.vmem %s2270_s10, 256 }
  0xf6   : > { %1752 = vmatprep.subr.bf16.mxu0 %v2362_v1  ;;  %p2272_p13 = scmp.lt.s32.totalorder %s2841_s23, %s2270_s10  ;;  %p2273_p3 = scmp.lt.s32.totalorder %s2271_s16, %s2265_s14 }
  0xf7   : > { %p2268_p12 = pneg %p2267_p11 }
  0xf8   : > { %p2274_p6 = por %p2273_p3, %p2272_p13 }
  0xf9   : > { %1753 = vmatpush3.bf16.msra.mxu0 %v2000_v9  ;;  %v2002_v9 = vld [vmem:[#allocation8 + $0x8] sm:$0xff]  }
  0xfa   : > { %1758 = vmatprep.subr.bf16.mxu0 %v2362_v1  ;;  %p2275_p9 = pnand %p2274_p6, %p2268_p12 }
  0xfc   : > { %1755 = vmatmul.mubr.msk.bf16.vlgmr.msra.gmra.mrb[4].mxu0 %vm477_vm0, %v419_v8 }
  0xfd   : > { %1760 = vmatprep.mubr.msk.bf16.mxu0 %vm2363_vm1, %v2362_v1 }
 0x1c7   : > { %v515_v17 = vpop.f32.mrb[0].mxu0 }
 0x1c8   : > { %v516_v18 = vadd.f32 %v515_v17, %v433_v15  ;;  %v517_v19 = vpop.f32.mrb[1].mxu0 }
 0x1c9   : > { %v519_v20 = vpop.f32.mrb[2].mxu0  ;;  %v518_v22 = vadd.f32 %v517_v19, %v437_v16 }
 0x1ca   : > { %v2724_v21 = vpack.c.bf16 %v516_v18, %v516_v18  ;;  %v520_v23 = vpop.f32.mrb[3].mxu0 }
 0x1cb   : > { %v2730_v25 = vpack.c.bf16 %v518_v22, %v518_v22 }
 0x1cc   : > { %684 = vrot.lane.b32.xlu0 %v2724_v21, %s2364_s12  ;;  %v573_v24 = vsel %vm477_vm0, %v2724_v21, 0 }
 0x1cd   : > { %1759 = vmatpush3.bf16.xpose.msra.mxu0 %v573_v24 }
 0x1ce   : > { %1770 = vmatprep.subr.bf16.mxu0 %v2362_v1 }
 0x1cf   : > { %v556_v28 = vpop.f32.mrb[4].mxu0 }
 0x1d0   : > { %681 = vrot.lane.b32.xlu0 %v2730_v25, %s2364_s12  ;;  %v1756_v29 = vpop.f32.mrb[5].mxu0  ;;  %v557_v32 = vadd.f32 %v556_v28, %v441_v27 }
 0x1d1   : > { %v559_v30 = vpop.f32.mrb[6].mxu0 }
 0x1d2   : > { %v1757_v31 = vpop.f32.mrb[7].mxu0  ;;  %v2739_v33 = vpack.c.bf16 %v557_v32, %v557_v32 }
 0x1d4   : > { %1761 = vmatmul.mubr.msk.bf16.vlgmr.msra.gmra.mrb[8].mxu0 %vm477_vm0, %v2730_v25  ;;  %v633_v34 = vsel %vm631_vm2, %v2739_v33, 0 }
 0x1d5   : > { %1772 = vmatprep.mubr.msk.bf16.mxu0 %vm2363_vm1, %v2362_v1  ;;  %1765 = vmatpush3.bf16.msra.mxu1 %v633_v34 }
 0x1d6   : > { %1776 = vmatprep.subr.bf16.mxu1 %v2362_v1 }
 0x23e   : > { %v685_v35 = vpop.permute.xlu0 %684 }
 0x23f   : > { %v690_v36 = vsel %vm477_vm0, %v685_v35, 0 }
 0x240   : > { %1771 = vmatpush3.bf16.xpose.msra.mxu0 %v690_v36 }
 0x241   : > { %1782 = vmatprep.subr.bf16.mxu0 %v2362_v1 }
 0x242   : > { %v682_v37 = vpop.permute.xlu0 %681 }
 0x247   : > { %1773 = vmatmul.mubr.msk.bf16.vlgmr.msra.gmra.mrb[12].mxu0 %vm477_vm0, %v682_v37 }
 0x248   : > { %1786 = vmatprep.mubr.msk.bf16.mxu0 %vm2363_vm1, %v2362_v1  ;;  %1783 = vmatpush3.bf16.msra.mxu0 %v2003_v62 }
 0x249   : > { %1784 = vmatprep.subr.bf16.mxu0 %v2362_v1 }
 0x24c   : > { %1785 = vmatpush3.bf16.msra.mxu0 %v2004_v63 }
 0x24d   : > { %1798 = vmatprep.subr.bf16.mxu0 %v2362_v1 }
 0x2a7   : > { %v609_v38 = vpop.f32.mrb[8].mxu0 }
 0x2a8   : > { %v1762_v39 = vpop.f32.mrb[9].mxu0  ;;  %v616_v40 = vsel %vm615_vm3, %v609_v38, -inf }
 0x2a9   : > { %617 = vmax.xlane.f32.xlu1 %v616_v40  ;;  %v612_v41 = vpop.f32.mrb[10].mxu0 }
 0x2aa   : > { %v1763_v42 = vpop.f32.mrb[11].mxu0 }
 0x31a   : > { %v726_v43 = vpop.f32.mrb[12].mxu0 }
 0x31b   : > { %v1774_v44 = vpop.f32.mrb[13].mxu0  ;;  %v732_v45 = vsel %vm615_vm3, %v726_v43, -inf }
 0x31c   : > { %733 = vmax.xlane.f32.xlu1 %v732_v45  ;;  %v729_v46 = vpop.f32.mrb[14].mxu0 }
 0x31d   : > { %v1775_v47 = vpop.f32.mrb[15].mxu0 }
 0x31e   : > { %v2005_v47 = vld [vmem:[#allocation8 + $0x20] sm:$0xff]  }
 0x336   : > { %v618_v48 = vpop.xlane.xlu1 %617 }
 0x337   : > { %v619_v49 = vsub.f32 %v609_v38, %v618_v48 }
 0x339   : > { %v620_v50 = vmul.f32 1.442695, %v619_v49 }
 0x33b   : > { %2019 = vpow2.f32 %v620_v50 }
 0x345   : > { %v2020_v51 = vpop.eup %2019 }
 0x346   : > { %v622_v52 = vsel %vm615_vm3, %v2020_v51, 0.0 }
 0x347   : > { %623 = vadd.xlane.f32.xlu0 %v622_v52 }
 0x35d   : > { %970 = vrot.lane.b32.xlu0 %v2739_v33, %s2365_s19 }
 0x3a9   : > { %v734_v53 = vpop.xlane.xlu1 %733 }
 0x3aa   : > { %v735_v54 = vsub.f32 %v726_v43, %v734_v53 }
 0x3ac   : > { %v736_v55 = vmul.f32 1.442695, %v735_v54 }
 0x3ae   : > { %2021 = vpow2.f32 %v736_v55 }
 0x3b8   : > { %v2022_v56 = vpop.eup %2021 }
 0x3b9   : > { %v738_v57 = vsel %vm615_vm3, %v2022_v56, 0.0 }
 0x3ba   : > { %739 = vadd.xlane.f32.xlu1 %v738_v57 }
 0x3cb   : > { %745 = vrot.lane.b32.xlu1 %v2739_v33, %s2364_s12 }
 0x3cf   : > { %910 = vrot.lane.b32.xlu1 %v2724_v21, %s2365_s19 }
 0x3d3   : > { %908 = vrot.lane.b32.xlu1 %v2730_v25, %s2365_s19 }
 0x3d4   : > { %v624_v58 = vpop.xlane.xlu0 %623 }
 0x3d5   : > { %2023 = vrcp.f32 %v624_v58 }
 0x3d8   : > { %v971_v10 = vpop.permute.xlu0 %970 }
 0x3d9   : > { %v976_v15 = vsel %vm631_vm2, %v971_v10, 0 }
 0x3df   : > { %v2024_v59 = vpop.eup %2023 }
 0x3e0   : > { %v626_v60 = vmul.f32 %v2024_v59, %v2020_v51 }
 0x3e2   : > { %v627_v61 = vpack.c.bf16 %v626_v60, %v626_v60 }
 0x3e4   : > { %1767 = vmatmul.mubr.msk.bf16.vlgmr.msra.gmra.mrb[0].mxu1 %vm615_vm3, %v627_v61 }
 0x3e5   : > { %1778 = vmatprep.mubr.msk.bf16.mxu1 %vm2363_vm1, %v2362_v1 }
 0x447   : > { %v740_v0 = vpop.xlane.xlu1 %739 }
 0x448   : > { %2025 = vrcp.f32 %v740_v0 }
 0x44b   : > { %v746_v2 = vpop.permute.xlu1 %745 }
 0x44c   : > { %v751_v3 = vsel %vm631_vm2, %v746_v2, 0 }
 0x44d   : > { %1777 = vmatpush3.bf16.msra.mxu1 %v751_v3 }
 0x44e   : > { %1790 = vmatprep.subr.bf16.mxu1 %v2362_v1 }
 0x44f   : > { %v911_v17 = vpop.permute.xlu1 %910 }
 0x450   : > { %v916_v23 = vsel %vm477_vm0, %v911_v17, 0 }
 0x452   : > { %v2026_v4 = vpop.eup %2025 }
 0x453   : > { %v742_v5 = vmul.f32 %v2026_v4, %v2022_v56  ;;  %v909_v26 = vpop.permute.xlu1 %908 }
 0x455   : > { %v743_v8 = vpack.c.bf16 %v742_v5, %v742_v5 }
 0x457   : > { %1779 = vmatmul.mubr.msk.bf16.vlgmr.msra.gmra.mrb[4].mxu1 %vm615_vm3, %v743_v8 }
 0x458   : > { %1791 = vmatpush3.bf16.msra.mxu1 %v2001_v7  ;;  %1794 = vmatprep.mubr.msk.bf16.mxu1 %vm2363_vm1, %v2362_v1  ;;  %v2007_v7 = vld [vmem:[#allocation8 + $0x30] sm:$0xff]  }
 0x459   : > { %1792 = vmatprep.subr.bf16.mxu1 %v2362_v1 }
 0x45c   : > { %1793 = vmatpush3.bf16.msra.mxu1 %v2002_v9 }
 0x45d   : > { %1804 = vmatprep.subr.bf16.mxu1 %v2362_v1 }
 0x4b7   : > { %v669_v11 = vpop.f32.mrb[0].mxu1 }
 0x4b8   : > { %v675_v12 = vpack.c.bf16 %v669_v11, %v669_v11  ;;  %v1768_v13 = vpop.f32.mrb[1].mxu1 }
 0x4b9   : > { %v672_v14 = vpop.f32.mrb[2].mxu1 }
 0x4ba   : > { %v1769_v16 = vpop.f32.mrb[3].mxu1  ;;  %1795 = vmatmul.mubr.msk.bf16.vlgmr.msra.gmra.mrb[8].mxu1 %vm477_vm0, %v675_v12 }
 0x4bb   : > { %1805 = vmatpush3.bf16.msra.mxu1 %v976_v15  ;;  %1806 = vmatprep.mubr.msk.bf16.mxu1 %vm2363_vm1, %v2362_v1 }
 0x4bc   : > { %1818 = vmatprep.subr.bf16.mxu1 %v2362_v1 }
 0x52a   : > { %v787_v18 = vpop.f32.mrb[4].mxu1 }
 0x52b   : > { %v793_v19 = vpack.c.bf16 %v787_v18, %v787_v18  ;;  %v1780_v20 = vpop.f32.mrb[5].mxu1  ;;  %v2008_v18 = vld [vmem:[#allocation8 + $0x38] sm:$0xff]  }
 0x52c   : > { %v790_v22 = vpop.f32.mrb[6].mxu1 }
 0x52d   : > { %v1781_v24 = vpop.f32.mrb[7].mxu1  ;;  %1787 = vmatmul.mubr.msk.bf16.vlgmr.msra.gmra.mrb[16].mxu0 %vm477_vm0, %v793_v19 }
 0x52e   : > { %1799 = vmatpush3.bf16.xpose.msra.mxu0 %v916_v23  ;;  %1800 = vmatprep.mubr.msk.bf16.mxu0 %vm2363_vm1, %v2362_v1 }
 0x52f   : > { %1810 = vmatprep.subr.bf16.mxu0 %v2362_v1 }
 0x535   : > { %1801 = vmatmul.mubr.msk.bf16.vlgmr.msra.gmra.mrb[20].mxu0 %vm477_vm0, %v909_v26 }
 0x536   : > { %1814 = vmatprep.mubr.msk.bf16.mxu0 %vm2363_vm1, %v2362_v1  ;;  %1811 = vmatpush3.bf16.msra.mxu0 %v2005_v47  ;;  %v2016_v47 = vld [vmem:[#allocation13 + $0x28] sm:$0xff]  }
 0x537   : > { %1812 = vmatprep.subr.bf16.mxu0 %v2362_v1 }
 0x58d   : > { %v898_v27 = vpop.f32.mrb[8].mxu1 }
 0x58e   : > { %v1796_v28 = vpop.f32.mrb[9].mxu1 }
 0x58f   : > { %v901_v29 = vpop.f32.mrb[10].mxu1 }
 0x590   : > { %v1797_v30 = vpop.f32.mrb[11].mxu1 }
 0x600   : > { %v843_v31 = vpop.f32.mrb[16].mxu0 }
 0x601   : > { %v2783_v32 = vadd.f32 %v898_v27, %v843_v31  ;;  %v1788_v34 = vpop.f32.mrb[17].mxu0  ;;  %v1685_v27 = vld [vmem:[#allocation14] ss:$0 sm:$0xff] }
 0x602   : > { %v846_v35 = vpop.f32.mrb[18].mxu0 }
 0x603   : > { %v1789_v36 = vpop.f32.mrb[19].mxu0 }
 0x608   : > { %v952_v37 = vpop.f32.mrb[20].mxu0 }
 0x609   : > { %v1802_v38 = vpop.f32.mrb[21].mxu0  ;;  %v958_v39 = vsel %vm615_vm3, %v952_v37, -inf }
 0x60a   : > { %959 = vmax.xlane.f32.xlu1 %v958_v39  ;;  %v955_v40 = vpop.f32.mrb[22].mxu0 }
 0x60b   : > { %v1803_v41 = vpop.f32.mrb[23].mxu0 }
 0x60c   : > { %v2009_v41 = vld [vmem:[#allocation10] sm:$0xff]  }
 0x697   : > { %v960_v42 = vpop.xlane.xlu1 %959 }
 0x698   : > { %v961_v43 = vsub.f32 %v952_v37, %v960_v42  ;;  %v2010_v42 = vld [vmem:[#allocation10 + $0x8] sm:$0xff]  }
 0x69a   : > { %v962_v44 = vmul.f32 1.442695, %v961_v43  ;;  %v2011_v43 = vld [vmem:[#allocation13] sm:$0xff]  }
 0x69c   : > { %2027 = vpow2.f32 %v962_v44  ;;  %v2012_v44 = vld [vmem:[#allocation13 + $0x8] sm:$0xff]  }
 0x6a6   : > { %v2028_v45 = vpop.eup %2027 }
 0x6a7   : > { %v964_v46 = vsel %vm615_vm3, %v2028_v45, 0.0 }
 0x6a8   : > { %965 = vadd.xlane.f32.xlu0 %v964_v46  ;;  %v2015_v46 = vld [vmem:[#allocation13 + $0x20] sm:$0xff]  }
 0x6be   : > { %1081 = vrot.lane.b32.xlu0 %v2724_v21, %s2366_s17 }
 0x6c2   : > { %1079 = vrot.lane.b32.xlu0 %v2730_v25, %s2366_s17  ;;  %v2006_v25 = vld [vmem:[#allocation8 + $0x28] sm:$0xff]  }
 0x6c3   : > { %1813 = vmatpush3.bf16.msra.mxu0 %v2006_v25 }
 0x6c4   : > { %1824 = vmatprep.subr.bf16.mxu0 %v2362_v1 }
 0x735   : > { %v966_v48 = vpop.xlane.xlu0 %965 }
 0x736   : > { %2029 = vrcp.f32 %v966_v48 }
 0x739   : > { %v1082_v51 = vpop.permute.xlu0 %1081 }
 0x73a   : > { %v1087_v53 = vsel %vm477_vm0, %v1082_v51, 0 }
 0x73d   : > { %v1080_v21 = vpop.permute.xlu0 %1079 }
 0x740   : > { %v2030_v49 = vpop.eup %2029 }
 0x741   : > { %v968_v50 = vmul.f32 %v2030_v49, %v2028_v45  ;;  %v2014_v45 = vld [vmem:[#allocation13 + $0x18] sm:$0xff]  }
 0x743   : > { %v969_v52 = vpack.c.bf16 %v968_v50, %v968_v50 }
 0x745   : > { %1807 = vmatmul.mubr.msk.bf16.vlgmr.msra.gmra.mrb[12].mxu1 %vm615_vm3, %v969_v52  ;;  %v1686_v52 = vld [vmem:[#allocation14 + $0x1] ss:$0 sm:$0xff] }
 0x746   : > { %1819 = vmatpush3.bf16.xpose.msra.mxu1 %v1087_v53  ;;  %1820 = vmatprep.mubr.msk.bf16.mxu1 %vm2363_vm1, %v2362_v1 }
 0x747   : > { %1830 = vmatprep.subr.bf16.mxu1 %v2362_v1 }
 0x74d   : > { %1821 = vmatmul.mubr.msk.bf16.vlgmr.msra.gmra.mrb[16].mxu1 %vm477_vm0, %v1080_v21  ;;  %v1687_v21 = vld [vmem:[#allocation14 + $0x2] ss:$0 sm:$0xff] }
 0x74e   : > { %1834 = vmatprep.mubr.msk.bf16.mxu1 %vm2363_vm1, %v2362_v1  ;;  %1831 = vmatpush3.bf16.msra.mxu1 %v2007_v7 }
 0x74f   : > { %1832 = vmatprep.subr.bf16.mxu1 %v2362_v1 }
 0x752   : > { %1833 = vmatpush3.bf16.msra.mxu1 %v2008_v18 }
 0x753   : > { %1846 = vmatprep.subr.bf16.mxu1 %v2362_v1 }
 0x818   : > { %v1012_v54 = vpop.f32.mrb[12].mxu1 }
 0x819   : > { %v1018_v55 = vpack.c.bf16 %v1012_v54, %v1012_v54  ;;  %v1808_v56 = vpop.f32.mrb[13].mxu1 }
 0x81a   : > { %v1015_v57 = vpop.f32.mrb[14].mxu1  ;;  %v2017_v56 = vld [vmem:[#allocation13 + $0x30] sm:$0xff]  }
 0x81b   : > { %v1809_v58 = vpop.f32.mrb[15].mxu1  ;;  %1815 = vmatmul.mubr.msk.bf16.vlgmr.msra.gmra.mrb[24].mxu0 %vm477_vm0, %v1018_v55  ;;  %v2018_v57 = vld [vmem:[#allocation13 + $0x38] sm:$0xff]  }
 0x81c   : > { %1826 = vmatprep.mubr.msk.bf16.mxu0 %vm2363_vm1, %v2362_v1  ;;  %v1688_v58 = vld [vmem:[#allocation11] ss:$0 sm:$0xff] }
 0x820   : > { %v1123_v59 = vpop.f32.mrb[16].mxu1 }
 0x821   : > { %v1822_v60 = vpop.f32.mrb[17].mxu1  ;;  %v1129_v61 = vsel %vm615_vm3, %v1123_v59, -inf }
 0x822   : > { %1130 = vmax.xlane.f32.xlu0 %v1129_v61  ;;  %v1126_v62 = vpop.f32.mrb[18].mxu1 }
 0x823   : > { %v1823_v63 = vpop.f32.mrb[19].mxu1 }
 0x8af   : > { %v1131_v0 = vpop.xlane.xlu0 %1130 }
 0x8b0   : > { %v1132_v2 = vsub.f32 %v1123_v59, %v1131_v0 }
 0x8b2   : > { %v1133_v3 = vmul.f32 1.442695, %v1132_v2 }
 0x8b4   : > { %2031 = vpow2.f32 %v1133_v3  ;;  %v1692_v3 = vld [vmem:[#allocation14 + $0x3] ss:$0 sm:$0xff] }
 0x8be   : > { %v2032_v4 = vpop.eup %2031 }
 0x8bf   : > { %v1135_v5 = vsel %vm615_vm3, %v2032_v4, 0.0 }
 0x8c0   : > { %1136 = vadd.xlane.f32.xlu1 %v1135_v5 }
 0x8d1   : > { %1141 = vrot.lane.b32.xlu1 %v2739_v33, %s2366_s17 }
 0x8ee   : > { %v1068_v8 = vpop.f32.mrb[24].mxu0 }
 0x8ef   : > { %v1074_v9 = vadd.f32 %v1068_v8, %v2783_v32  ;;  %v1816_v10 = vpop.f32.mrb[25].mxu0 }
 0x8f0   : > { %v1071_v11 = vpop.f32.mrb[26].mxu0 }
 0x8f1   : > { %v1817_v12 = vpop.f32.mrb[27].mxu0 }
 0x94d   : > { %v1137_v13 = vpop.xlane.xlu1 %1136 }
 0x94e   : > { %2033 = vrcp.f32 %v1137_v13 }
 0x951   : > { %v1142_v14 = vpop.permute.xlu1 %1141 }
 0x952   : > { %v1147_v15 = vsel %vm631_vm2, %v1142_v14, 0 }
 0x953   : > { %1825 = vmatpush3.bf16.msra.mxu0 %v1147_v15 }
 0x954   : > { %1838 = vmatprep.subr.bf16.mxu0 %v2362_v1 }
 0x958   : > { %v2034_v16 = vpop.eup %2033 }
 0x959   : > { %v1139_v33 = vmul.f32 %v2034_v16, %v2032_v4 }
 0x95b   : > { %v1140_v17 = vpack.c.bf16 %v1139_v33, %v1139_v33 }
 0x95d   : > { %1827 = vmatmul.mubr.msk.bf16.vlgmr.msra.gmra.mrb[28].mxu0 %vm615_vm3, %v1140_v17 }
 0x95e   : > { %1842 = vmatprep.mubr.msk.bf16.mxu0 %vm2363_vm1, %v2362_v1  ;;  %1839 = vmatpush3.bf16.msra.mxu0 %v2009_v41 }
 0x95f   : > { %1840 = vmatprep.subr.bf16.mxu0 %v2362_v1 }
 0x962   : > { %1841 = vmatpush3.bf16.msra.mxu0 %v2010_v42 }
 0xa30   : > { %v1183_v19 = vpop.f32.mrb[28].mxu0 }
 0xa31   : > { %v1189_v20 = vpack.c.bf16 %v1183_v19, %v1183_v19  ;;  %v1828_v22 = vpop.f32.mrb[29].mxu0  ;;  %v1701_v19 = vld [vmem:[#allocation14 + $0x4] ss:$0 sm:$0xff] }
 0xa32   : > { %v1186_v23 = vpop.f32.mrb[30].mxu0  ;;  %v1702_v22 = vld [vmem:[#allocation14 + $0x5] ss:$0 sm:$0xff] }
 0xa33   : > { %v1829_v24 = vpop.f32.mrb[31].mxu0  ;;  %1835 = vmatmul.mubr.msk.bf16.vlgmr.msra.gmra.mrb[20].mxu1 %vm477_vm0, %v1189_v20 }
 0xa34   : > { %1862 = vmatprep.mubr.msk.bf16.mxu1 %vm2363_vm1, %v2362_v1  ;;  %1847 = vmatpush3.bf16.msra.mxu1 %v2011_v43 }
 0xa35   : > { %1848 = vmatprep.subr.bf16.mxu1 %v2362_v1 }
 0xa38   : > { %1849 = vmatpush3.bf16.msra.mxu1 %v2012_v44 }
 0xa39   : > { %1850 = vmatprep.subr.bf16.mxu1 %v2362_v1 }
 0xb06   : > { %v1239_v26 = vpop.f32.mrb[20].mxu1 }
 0xb07   : > { %v1245_v28 = vadd.f32 %v1239_v26, %v1074_v9  ;;  %v1836_v29 = vpop.f32.mrb[21].mxu1 }
 0xb08   : > { %v1242_v30 = vpop.f32.mrb[22].mxu1 }
 0xb09   : > { %v1256_v31 = vadd.f32 %v1685_v27, %v1245_v28  ;;  %v1837_v32 = vpop.f32.mrb[23].mxu1 }
 0xb0b   : > { %v1257_v34 = vadd.f32 %v1256_v31, %v2709_v6  ;;  %v2013_v6 = vld [vmem:[#allocation13 + $0x10] sm:$0xff]  }
 0xb0c   : > { %1851 = vmatpush3.bf16.msra.mxu1 %v2013_v6 }
 0xb0d   : > { %v1258_v35 = vsel %vm477_vm0, %v1257_v34, 0.0  ;;  %1852 = vmatprep.subr.bf16.mxu1 %v2362_v1 }
 0xb0e   : > { %1259 = vadd.xlane.f32.xlu1 %v1258_v35 }
 0xb10   : > { %1853 = vmatpush3.bf16.msra.mxu1 %v2014_v45 }
 0xb11   : > { %1854 = vmatprep.subr.bf16.mxu1 %v2362_v1 }
 0xb14   : > { %1855 = vmatpush3.bf16.msra.mxu1 %v2015_v46 }
 0xb15   : > { %1856 = vmatprep.subr.bf16.mxu1 %v2362_v1 }
 0xb18   : > { %1857 = vmatpush3.bf16.msra.mxu1 %v2016_v47 }
 0xb19   : > { %1858 = vmatprep.subr.bf16.mxu1 %v2362_v1 }
 0xb1c   : > { %1859 = vmatpush3.bf16.msra.mxu1 %v2017_v56 }
 0xb1d   : > { %1860 = vmatprep.subr.bf16.mxu1 %v2362_v1 }
 0xb20   : > { %1861 = vmatpush3.bf16.msra.mxu1 %v2018_v57 }
 0xb9b   : > { %v1260_v36 = vpop.xlane.xlu1 %1259 }
 0xb9c   : > { %v1262_v37 = vmul.f32 0.03125, %v1260_v36 }
 0xb9e   : > { %v1263_v38 = vsub.f32 %v1257_v34, %v1262_v37 }
 0xba0   : > { %v1264_v39 = vmul.f32 %v1263_v38, %v1263_v38 }
 0xba2   : > { %v1265_v40 = vsel %vm477_vm0, %v1264_v39, 0.0 }
 0xba3   : > { %1266 = vadd.xlane.f32.xlu0 %v1265_v40 }
 0xc30   : > { %v1267_v48 = vpop.xlane.xlu0 %1266 }
 0xc31   : > { %v1268_v49 = vmul.f32 0.03125, %v1267_v48 }
 0xc33   : > { %v1269_v50 = vadd.f32 1e-05, %v1268_v49 }
 0xc35   : > { %2035 = vrsqrt.f32 %v1269_v50 }
 0xc3f   : > { %v2036_v51 = vpop.eup %2035 }
 0xc40   : > { %v1271_v53 = vmul.f32 %v2036_v51, %v1263_v38 }
 0xc42   : > { %v1276_v25 = vmul.f32 %v1686_v52, %v1271_v53 }
 0xc44   : > { %v1281_v54 = vadd.f32 %v1687_v21, %v1276_v25 }
 0xc46   : > { %v1282_v55 = vpack.c.bf16 %v1281_v54, %v1281_v54 }
 0xc48   : > { %1843 = vmatmul.mubr.msk.bf16.vlgmr.msra.gmra.mrb[32].mxu0 %vm477_vm0, %v1282_v55 }
 0xd1b   : > { %v1343_v59 = vpop.f32.mrb[32].mxu0 }
 0xd1c   : > { %v1344_v60 = vadd.f32 %v1688_v58, %v1343_v59  ;;  %v1844_v61 = vpop.f32.mrb[33].mxu0 }
 0xd1d   : > { %v1346_v62 = vpop.f32.mrb[34].mxu0 }
 0xd1e   : > { %v1349_v63 = vmax.f32 %v1344_v60, 0.0  ;;  %v1845_v0 = vpop.f32.mrb[35].mxu0 }
 0xd20   : > { %v1350_v2 = vpack.c.bf16 %v1349_v63, %v1349_v63 }
 0xd22   : > { %1863 = vmatmul.mubr.bf16.vlgmr.msra.gmra.mrb[24].mxu1 %v1350_v2 }
 0xdf5   : > { %v1453_v4 = vpop.f32.mrb[24].mxu1 }
 0xdf6   : > { %v1454_v5 = vadd.f32 %v1692_v3, %v1453_v4  ;;  %v1864_v7 = vpop.f32.mrb[25].mxu1 }
 0xdf7   : > { %v1456_v8 = vpop.f32.mrb[26].mxu1 }
 0xdf8   : > { %v1865_v9 = vpop.f32.mrb[27].mxu1  ;;  %v1459_v10 = vadd.f32 %v1454_v5, %v1281_v54 }
 0xdfa   : > { %v1460_v1 = vsel %vm477_vm0, %v1459_v10, 0.0 }
 0xdfb   : > { %1461 = vadd.xlane.f32.xlu0 %v1460_v1 }
 0xe88   : > { %v1462_v11 = vpop.xlane.xlu0 %1461 }
 0xe89   : > { %v1463_v12 = vmul.f32 0.03125, %v1462_v11 }
 0xe8b   : > { %v1464_v13 = vsub.f32 %v1459_v10, %v1463_v12 }
 0xe8d   : > { %v1465_v14 = vmul.f32 %v1464_v13, %v1464_v13 }
 0xe8f   : > { %v1466_v15 = vsel %vm477_vm0, %v1465_v14, 0.0 }
 0xe90   : > { %1467 = vadd.xlane.f32.xlu0 %v1466_v15 }
 0xf1d   : > { %v1468_v16 = vpop.xlane.xlu0 %1467 }
 0xf1e   : > { %v1469_v33 = vmul.f32 0.03125, %v1468_v16 }
 0xf20   : > { %v1470_v17 = vadd.f32 1e-05, %v1469_v33 }
 0xf22   : > { %2037 = vrsqrt.f32 %v1470_v17 }
 0xf2c   : > { %v2038_v18 = vpop.eup %2037 }
 0xf2d   : > { %v1472_v20 = vmul.f32 %v2038_v18, %v1464_v13 }
 0xf2f   : > { %v1477_v23 = vmul.f32 %v1701_v19, %v1472_v20 }
 0xf31   : > { %v1482_v24 = vadd.f32 %v1702_v22, %v1477_v23 }
 0xf33   : > { %1483 = vst.msk [vmem:[%s416_s20] sm:$0xff] %vm477_vm0, %v1482_v24 }
 0xf34   : > { %2278 = shalt.err (!%p2275_p9)
}
 0xf35   : > { %s2279_s9 = scalar_lea.hbm %s2839_s22, 128  ;;  %s2283_s17 = scalar_lea.hbm %s2892_s8, 256 }
 0xf36   : > { %p2280_p4 = scmp.ne.s32.totalorder %s2839_s22, %s2279_s9  ;;  %p2284_p5 = scmp.lt.u32.totalorder %s2839_s22, %s2892_s8 }
 0xf37   : > { %p2285_p2 = scmp.lt.u32.totalorder %s2283_s17, %s2279_s9  ;;  %p2287_p10 = scmp.lt.u32.totalorder %s2279_s9, %s2839_s22 }
 0xf38   : > { %p2281_p8 = pnand %p2280_p4, %p2918_p1 }
 0xf39   : > { %p2286_p7 = por %p2285_p2, %p2284_p5 }
 0xf3a   : > { %p2282_p0 = pneg %p2281_p8 }
 0xf3b   : > { %p2288_p11 = por %p2287_p10, %p2286_p7 }
 0xf3d   : > { %p2289_p12 = pnand %p2288_p11, %p2282_p0 }
 0xf3f   : > { %2292 = shalt.err (!%p2289_p12)
}
 0xf40   : > { %1896 = dma.vmem_to_hbm [thread:$0]  (%p2918_p1), %s2841_s23, 128, %s2839_s22, %s1485_s26  }
 0xf41 PF: > { %s1510_s21 = sand.u32 1, %s2335_s27   ;;  %p2919_p13 = scmp.ne.s32.totalorder %s2907_s24, 0 }
 0xf42   : > { %p2920_p3 = scmp.ge.s32.totalorder %s2347_s30, 2  ;;  %s1511_s18 = scalar_lea.sflag [#allocation4], %s1510_s21 }
 0xf44   : > { %p1925_p6 = pnand %p2920_p3, %p2919_p13 }
 0xf46   : > { %2330 = dma.done.wait (!%p1925_p6), %s1511_s18, 128  }
 0xf47   : > { %2332 = vsyncadd (!%p1925_p6), %s1511_s18, 4294967168  ;;  %p25_p9 = scmp.ge.s32.totalorder %s2612_s15, 4   ;;  %s2921_s27 = smov %s2339_s28 }
 0xf48   : > { %s2922_s28 = smov %s2343_s29  ;;  %s2923_s29 = smov %s2624_s1 }
 0xf49   : > { %s2924_s30 = smov %s2612_s15  ;;  %27 = sbr.rel (!%p25_p9) target bundleno = 11 (0xb), region = 125 }
 0xf50   :  { %1516 = vsyncpa [#allocation3], 1 }
 0xf51   :  { %1518 = vsyncpa [#allocation3 + $0x1], 1 }
 0xf52   :  { %1519 = vsyncpa [#allocation6], 1 }
 0xf53   :  { %1520 = vsyncpa [#allocation9], 1 }
 0xf54   :  { %1521 = vsyncpa [#allocation12], 1 }
 0xf55   :  { %1522 = vsyncpa [#allocation15], 1 }
 0xf56   :  { %1523 = vsyncpa [#allocation4], 1 }
 0xf57   :  { %1525 = vsyncpa [#allocation4 + $0x1], 1 }

</bundles_post_ra>
